<compile_context>
chip_gen: v6e
topology: v6e:2x2x1
jax: 0.10.0
libtpu: 0.0.40
codegen_flags: <defaults>
</compile_context>

<pallas_src>
import jax
import jax.numpy as jnp
from jax import lax
from jax.experimental import pallas as pl
from jax.experimental.pallas import tpu as pltpu

# ---------------- module hyper-parameters (consistent with __init__) --------
DIM = 32          # `dim`
KEY_DIM = 16      # `key_dim`
NUM_HEADS = 2     # `num_heads`
ATTN_RATIO = 2    # `attn_ratio`
D = ATTN_RATIO * KEY_DIM            # self.d   = 32
DH = D * NUM_HEADS                  # self.dh  = 64
NH_KD = KEY_DIM * NUM_HEADS         # self.nh_kd = 32
QKV_CH = 2 * NH_KD + DH             # fused q|k|v output channels = 128
B, H, W = 2, 8, 8
N = H * W                           # tokens per image = 64


# ------------------------------- kernel -------------------------------------
def _attention_kernel(x_ref, wqkv_ref, bqkv_ref, wp_ref, bp_ref, o_ref):
    """Whole batch in one grid step, channels-first, batch lane-packed.

    x_ref   : (B, DIM, N)     NCHW input with H*W flattened
    wqkv_ref: (QKV_CH, DIM)   fused BN-folded 1x1 conv [Wq; Wk; Wv]
    bqkv_ref: (QKV_CH, 1)     fused folded bias (per output channel)
    wp_ref  : (DIM, DH)       BN-folded output projection (natural layout)
    bp_ref  : (DIM, 1)
    o_ref   : (DIM, B*N)      lane-dense channels-first output slab
    """
    bsz, _, n = x_ref.shape
    num_heads = NUM_HEADS

    # Lane-pack the batch: (DIM, B*N) = (32, 128) -> full 128-lane vregs.
    # (small in-kernel lane concat; keeps the wrapper transpose-free on input)
    x_packed = jnp.concatenate([x_ref[b] for b in range(bsz)], axis=-1)

    # Fused q|k|v 1x1 conv + folded BN: one (128, 32) @ (32, 128) MXU pass.
    qkv = jnp.dot(wqkv_ref[...], x_packed,
                  preferred_element_type=jnp.float32) + bqkv_ref[...]  # (128, B*N)

    # ---- attention scores, per (batch, head) ------------------------------
    # NOTE: the reference forward does NOT apply self.scale (defined, unused).
    scores = []
    for b in range(bsz):                       # static unroll (B tiny)
        for h in range(num_heads):             # static unroll (2 heads)
            q = qkv[h * KEY_DIM:(h + 1) * KEY_DIM, b * n:(b + 1) * n]          # (kd, N)
            k = qkv[NH_KD + h * KEY_DIM:NH_KD + (h + 1) * KEY_DIM,
                    b * n:(b + 1) * n]                                          # (kd, N)
            # s[i, j] = sum_d q[d, i] * k[d, j]
            scores.append(jnp.dot(q.T, k, preferred_element_type=jnp.float32))  # (N, N)
    s_all = jnp.concatenate(scores, axis=0)    # sublane-stacked (B*heads*N, N) = (256, 64)

    # ---- one batched, numerically-stable softmax sweep (exact norm) -------
    m = jnp.max(s_all, axis=-1, keepdims=True)
    p = jnp.exp(s_all - m)
    l = jnp.sum(p, axis=-1, keepdims=True)
    p = p / l                                  # exact division -> ~1e-6 accuracy

    # ---- P @ V per (batch, head), channels-first ---------------------------
    # Heads stack on sublanes (channel axis), batches on lanes -> one
    # (DH, B*N) = (64, 128) slab; ReLU applied once on the whole slab.
    head_rows = []
    for h in range(num_heads):
        per_batch = []
        for b in range(bsz):
            blk = b * num_heads + h
            ph = p[blk * n:(blk + 1) * n, :]                                    # (N, N)
            v = qkv[2 * NH_KD + h * D:2 * NH_KD + (h + 1) * D,
                    b * n:(b + 1) * n]                                          # (D, N)
            # head[e, i] = sum_j v[e, j] * p[i, j]  (transposed-RHS dot_general)
            per_batch.append(lax.dot_general(
                v, ph, (((1,), (1,)), ((), ())),
                preferred_element_type=jnp.float32))                            # (D, N)
        head_rows.append(jnp.concatenate(per_batch, axis=-1))                   # (D, B*N)
    head_all = jnp.concatenate(head_rows, axis=0)                               # (DH, B*N)
    head_all = jnp.maximum(head_all, 0.0)       # proj activation (ReLU) before conv

    # ---- single output projection on the full 128-lane slab ----------------
    o_ref[...] = (jnp.dot(wp_ref[...], head_all,
                          preferred_element_type=jnp.float32) + bp_ref[...])    # (DIM, B*N)


# ------------------------------ wrapper --------------------------------------
@jax.jit
def attention_forward(x_nchw, kparams):
    """x_nchw: (B, DIM, H, W) float32 -> (B, DIM, H, W) float32."""
    b, c, h, w = x_nchw.shape
    n = h * w
    x_cf = x_nchw.reshape(b, c, n)        # free reshape; stays channels-first

    out = pl.pallas_call(
        _attention_kernel,
        out_shape=jax.ShapeDtypeStruct((DIM, b * n), jnp.float32),
        grid_spec=pltpu.PrefetchScalarGridSpec(
            num_scalar_prefetch=0,
            grid=(1,),                    # whole batch in a single step
            in_specs=[
                pl.BlockSpec((b, DIM, n), lambda i: (0, 0, 0)),
                pl.BlockSpec((QKV_CH, DIM), lambda i: (0, 0)),
                pl.BlockSpec((QKV_CH, 1), lambda i: (0, 0)),
                pl.BlockSpec((DIM, DH), lambda i: (0, 0)),
                pl.BlockSpec((DIM, 1), lambda i: (0, 0)),
            ],
            out_specs=pl.BlockSpec((DIM, b * n), lambda i: (0, 0)),
        ),
        compiler_params=pltpu.CompilerParams(
            dimension_semantics=("arbitrary",)),
    )(x_cf, kparams["wqkv"], kparams["bqkv"], kparams["wp"], kparams["bp"])

    # Lane-dense (DIM, B*N) slab -> NCHW.  Tiny (16 KiB) wrapper-side unpack;
    # trade accepted for the single unmasked 128-lane store inside the kernel.
    return out.reshape(DIM, b, n).transpose(1, 0, 2).reshape(b, DIM, h, w)


# ----------------------- parameter construction ------------------------------
def _fold_conv_bn(key, c_out, c_in, eps=1e-5):
    """Deterministic 1x1 Conv2d (no bias) + BatchNorm2d, folded to (W, b).

    Eval-mode BN:  y = gamma * (conv - mean) / sqrt(var + eps) + beta
    folded:        W_f = (gamma / sqrt(var+eps))[:, None] * W
                   b_f = beta - gamma * mean / sqrt(var+eps)
    Random (PRNG-deterministic) values keep the compute path non-trivial (the
    literal __init__ sets proj BN gamma = 0 -> all-zero output otherwise).
    """
    kw, kg, kb, km, kv = jax.random.split(key, 5)
    w = jax.random.normal(kw, (c_out, c_in), jnp.float32) * 0.1
    gamma = 1.0 + 0.1 * jax.random.normal(kg, (c_out,), jnp.float32)
    beta = 0.1 * jax.random.normal(kb, (c_out,), jnp.float32)
    mean = 0.1 * jax.random.normal(km, (c_out,), jnp.float32)
    var = jax.nn.softplus(jax.random.normal(kv, (c_out,), jnp.float32)) + 0.5
    scale = gamma / jnp.sqrt(var + eps)
    w_f = w * scale[:, None]
    b_f = (beta - mean * scale)[None, :]
    return w_f, b_f


def make_params(key):
    k1, k2, k3, k4 = jax.random.split(key, 4)
    wq, bq = _fold_conv_bn(k1, NH_KD, DIM)
    wk, bk = _fold_conv_bn(k2, NH_KD, DIM)
    wv, bv = _fold_conv_bn(k3, DH, DIM)
    wp, bp = _fold_conv_bn(k4, DIM, DH)
    return dict(wq=wq, bq=bq, wk=wk, bk=bk, wv=wv, bv=bv, wp=wp, bp=bp)


def pack_params(p):
    """One-time wrapper-side packing into the kernel's fused layout."""
    wqkv = jnp.concatenate([p["wq"], p["wk"], p["wv"]], axis=0)          # (128, 32)
    bqkv = jnp.concatenate([p["bq"], p["bk"], p["bv"]], axis=1).reshape(QKV_CH, 1)
    return dict(wqkv=wqkv, bqkv=bqkv,
                wp=p["wp"],                       # (32, 64) natural (out, in)
                bp=p["bp"].reshape(DIM, 1))


# -------------------------- pure-JAX reference --------------------------------
def reference_forward(x_nchw, p):
    b, c, h, w = x_nchw.shape
    n = h * w
    x = jnp.transpose(x_nchw.reshape(b, c, n), (0, 2, 1))            # (B, N, C)
    q = x @ p["wq"].T + p["bq"]                                       # (B, N, NH_KD)
    k = x @ p["wk"].T + p["bk"]
    v = x @ p["wv"].T + p["bv"]                                       # (B, N, DH)
    qq = q.reshape(b, n, NUM_HEADS, KEY_DIM).transpose(0, 2, 1, 3)    # (B,h,N,kd)
    kk = k.reshape(b, n, NUM_HEADS, KEY_DIM).transpose(0, 2, 1, 3)
    vv = v.reshape(b, n, NUM_HEADS, D).transpose(0, 2, 1, 3)          # (B,h,N,d)
    attn = jnp.einsum("bhqk,bhlk->bhql", qq, kk)                      # no scale!
    attn = jax.nn.softmax(attn, axis=-1)
    xx = jnp.einsum("bhql,bhld->bhqd", attn, vv)                      # (B,h,N,d)
    xx = xx.transpose(0, 2, 1, 3).reshape(b, n, DH)                   # (B, N, DH)
    xx = jnp.maximum(xx, 0.0)                                         # ReLU
    out = xx @ p["wp"].T + p["bp"]                                    # (B, N, DIM)
    return jnp.transpose(out, (0, 2, 1)).reshape(b, DIM, h, w)


# ---------------------------------- main --------------------------------------
if __name__ == "__main__":
    key = jax.random.PRNGKey(0)
    kx, kp = jax.random.split(key)
    x = jax.random.normal(kx, (B, DIM, H, W), jnp.float32)
    raw_params = make_params(kp)
    kparams = pack_params(raw_params)

    out = attention_forward(x, kparams)
    out = jax.block_until_ready(out)

    ref = reference_forward(x, raw_params)
    assert out.shape == (B, DIM, H, W), out.shape
    # Exact softmax normalization -> only MXU-vs-XLA accumulation-order noise.
    assert jnp.allclose(out, ref, atol=1e-4, rtol=1e-4), \
        float(jnp.max(jnp.abs(out - ref)))

    print("KERNEL_OK")
</pallas_src>

<mosaic_0001>
module attributes {stable_mosaic.version = 11 : i64} {
  func.func @_attention_kernel(%arg0: i32, %arg1: memref<2x32x64xf32, #tpu.memory_space<vmem>>, %arg2: memref<128x32xf32, #tpu.memory_space<vmem>>, %arg3: memref<128x1xf32, #tpu.memory_space<vmem>>, %arg4: memref<32x64xf32, #tpu.memory_space<vmem>>, %arg5: memref<32x1xf32, #tpu.memory_space<vmem>>, %arg6: memref<32x128xf32, #tpu.memory_space<vmem>>) attributes {dimension_semantics = [#tpu.dimension_semantics<arbitrary>], iteration_bounds = array<i64: 1>, scalar_prefetch = 0 : i64, scratch_operands = 0 : i64, tpu.core_type = #tpu.core_type<tc>, window_params = [{pipeline_mode = #tpu.pipeline_mode<synchronous>, transform_indices = @transform_0, window_bounds = array<i64: 2, 32, 64>}, {pipeline_mode = #tpu.pipeline_mode<synchronous>, transform_indices = @transform_1, window_bounds = array<i64: 128, 32>}, {pipeline_mode = #tpu.pipeline_mode<synchronous>, transform_indices = @transform_2, window_bounds = array<i64: 128, 1>}, {pipeline_mode = #tpu.pipeline_mode<synchronous>, transform_indices = @transform_3, window_bounds = array<i64: 32, 64>}, {pipeline_mode = #tpu.pipeline_mode<synchronous>, transform_indices = @transform_4, window_bounds = array<i64: 32, 1>}, {pipeline_mode = #tpu.pipeline_mode<synchronous>, transform_indices = @transform_5, window_bounds = array<i64: 32, 128>}]} {
    %c0 = arith.constant 0 : index
    %c0_0 = arith.constant 0 : index
    %c0_1 = arith.constant 0 : index
    %0 = vector.load %arg1[%c0, %c0_0, %c0_1] : memref<2x32x64xf32, #tpu.memory_space<vmem>>, vector<1x32x64xf32>
    %1 = vector.shape_cast %0 : vector<1x32x64xf32> to vector<32x64xf32>
    %c1 = arith.constant 1 : index
    %c0_2 = arith.constant 0 : index
    %c0_3 = arith.constant 0 : index
    %2 = vector.load %arg1[%c1, %c0_2, %c0_3] : memref<2x32x64xf32, #tpu.memory_space<vmem>>, vector<1x32x64xf32>
    %3 = vector.shape_cast %2 : vector<1x32x64xf32> to vector<32x64xf32>
    %4 = tpu.concatenate %1, %3 in 1 : vector<32x64xf32>, vector<32x64xf32> -> vector<32x128xf32>
    %c0_4 = arith.constant 0 : index
    %c0_5 = arith.constant 0 : index
    %5 = vector.load %arg2[%c0_4, %c0_5] : memref<128x32xf32, #tpu.memory_space<vmem>>, vector<128x32xf32>
    %cst = arith.constant dense<0.000000e+00> : vector<128x128xf32>
    %6 = tpu.matmul %5, %4, %cst {dimension_numbers = #tpu.dot_dimension_numbers<[1], [0], [0], [1], [0, 0, 1, 1], [], []>} : vector<128x32xf32>, vector<32x128xf32>, vector<128x128xf32> -> vector<128x128xf32>
    %c0_6 = arith.constant 0 : index
    %c0_7 = arith.constant 0 : index
    %7 = vector.load %arg3[%c0_6, %c0_7] : memref<128x1xf32, #tpu.memory_space<vmem>>, vector<128x1xf32>
    %8 = vector.broadcast %7 : vector<128x1xf32> to vector<128x128xf32>
    %9 = arith.addf %6, %8 : vector<128x128xf32>
    %10 = vector.extract_strided_slice %9 {offsets = [0, 0], sizes = [16, 64], strides = [1, 1]} : vector<128x128xf32> to vector<16x64xf32>
    %11 = vector.extract_strided_slice %9 {offsets = [32, 0], sizes = [16, 64], strides = [1, 1]} : vector<128x128xf32> to vector<16x64xf32>
    %12 = tpu.transpose %10, [1, 0] : vector<16x64xf32> -> vector<64x16xf32>
    %cst_8 = arith.constant dense<0.000000e+00> : vector<64x64xf32>
    %13 = tpu.matmul %12, %11, %cst_8 {dimension_numbers = #tpu.dot_dimension_numbers<[1], [0], [0], [1], [0, 0, 1, 1], [], []>} : vector<64x16xf32>, vector<16x64xf32>, vector<64x64xf32> -> vector<64x64xf32>
    %14 = vector.extract_strided_slice %9 {offsets = [16, 0], sizes = [16, 64], strides = [1, 1]} : vector<128x128xf32> to vector<16x64xf32>
    %15 = vector.extract_strided_slice %9 {offsets = [48, 0], sizes = [16, 64], strides = [1, 1]} : vector<128x128xf32> to vector<16x64xf32>
    %16 = tpu.transpose %14, [1, 0] : vector<16x64xf32> -> vector<64x16xf32>
    %cst_9 = arith.constant dense<0.000000e+00> : vector<64x64xf32>
    %17 = tpu.matmul %16, %15, %cst_9 {dimension_numbers = #tpu.dot_dimension_numbers<[1], [0], [0], [1], [0, 0, 1, 1], [], []>} : vector<64x16xf32>, vector<16x64xf32>, vector<64x64xf32> -> vector<64x64xf32>
    %18 = vector.extract_strided_slice %9 {offsets = [0, 64], sizes = [16, 64], strides = [1, 1]} : vector<128x128xf32> to vector<16x64xf32>
    %19 = vector.extract_strided_slice %9 {offsets = [32, 64], sizes = [16, 64], strides = [1, 1]} : vector<128x128xf32> to vector<16x64xf32>
    %20 = tpu.transpose %18, [1, 0] : vector<16x64xf32> -> vector<64x16xf32>
    %cst_10 = arith.constant dense<0.000000e+00> : vector<64x64xf32>
    %21 = tpu.matmul %20, %19, %cst_10 {dimension_numbers = #tpu.dot_dimension_numbers<[1], [0], [0], [1], [0, 0, 1, 1], [], []>} : vector<64x16xf32>, vector<16x64xf32>, vector<64x64xf32> -> vector<64x64xf32>
    %22 = vector.extract_strided_slice %9 {offsets = [16, 64], sizes = [16, 64], strides = [1, 1]} : vector<128x128xf32> to vector<16x64xf32>
    %23 = vector.extract_strided_slice %9 {offsets = [48, 64], sizes = [16, 64], strides = [1, 1]} : vector<128x128xf32> to vector<16x64xf32>
    %24 = tpu.transpose %22, [1, 0] : vector<16x64xf32> -> vector<64x16xf32>
    %cst_11 = arith.constant dense<0.000000e+00> : vector<64x64xf32>
    %25 = tpu.matmul %24, %23, %cst_11 {dimension_numbers = #tpu.dot_dimension_numbers<[1], [0], [0], [1], [0, 0, 1, 1], [], []>} : vector<64x16xf32>, vector<16x64xf32>, vector<64x64xf32> -> vector<64x64xf32>
    %26 = tpu.concatenate %13, %17, %21, %25 in 0 : vector<64x64xf32>, vector<64x64xf32>, vector<64x64xf32>, vector<64x64xf32> -> vector<256x64xf32>
    %cst_12 = arith.constant dense<0xFF800000> : vector<256xf32>
    %27 = vector.multi_reduction <maximumf>, %26, %cst_12 [1] : vector<256x64xf32> to vector<256xf32>
    %28 = vector.shape_cast %27 : vector<256xf32> to vector<256x1xf32>
    %29 = vector.broadcast %28 : vector<256x1xf32> to vector<256x64xf32>
    %30 = arith.subf %26, %29 : vector<256x64xf32>
    %31 = math.exp %30 : vector<256x64xf32>
    %cst_13 = arith.constant dense<0.000000e+00> : vector<256xf32>
    %32 = vector.multi_reduction <add>, %31, %cst_13 [1] : vector<256x64xf32> to vector<256xf32>
    %33 = vector.shape_cast %32 : vector<256xf32> to vector<256x1xf32>
    %34 = vector.broadcast %33 : vector<256x1xf32> to vector<256x64xf32>
    %35 = arith.divf %31, %34 : vector<256x64xf32>
    %36 = vector.extract_strided_slice %35 {offsets = [0, 0], sizes = [64, 64], strides = [1, 1]} : vector<256x64xf32> to vector<64x64xf32>
    %37 = vector.extract_strided_slice %9 {offsets = [64, 0], sizes = [32, 64], strides = [1, 1]} : vector<128x128xf32> to vector<32x64xf32>
    %cst_14 = arith.constant dense<0.000000e+00> : vector<32x64xf32>
    %38 = tpu.matmul %37, %36, %cst_14 {dimension_numbers = #tpu.dot_dimension_numbers<[1], [1], [0], [0], [0, 0, 1, 0], [], []>} : vector<32x64xf32>, vector<64x64xf32>, vector<32x64xf32> -> vector<32x64xf32>
    %39 = vector.extract_strided_slice %35 {offsets = [128, 0], sizes = [64, 64], strides = [1, 1]} : vector<256x64xf32> to vector<64x64xf32>
    %40 = vector.extract_strided_slice %9 {offsets = [64, 64], sizes = [32, 64], strides = [1, 1]} : vector<128x128xf32> to vector<32x64xf32>
    %cst_15 = arith.constant dense<0.000000e+00> : vector<32x64xf32>
    %41 = tpu.matmul %40, %39, %cst_15 {dimension_numbers = #tpu.dot_dimension_numbers<[1], [1], [0], [0], [0, 0, 1, 0], [], []>} : vector<32x64xf32>, vector<64x64xf32>, vector<32x64xf32> -> vector<32x64xf32>
    %42 = tpu.concatenate %38, %41 in 1 : vector<32x64xf32>, vector<32x64xf32> -> vector<32x128xf32>
    %43 = vector.extract_strided_slice %35 {offsets = [64, 0], sizes = [64, 64], strides = [1, 1]} : vector<256x64xf32> to vector<64x64xf32>
    %44 = vector.extract_strided_slice %9 {offsets = [96, 0], sizes = [32, 64], strides = [1, 1]} : vector<128x128xf32> to vector<32x64xf32>
    %cst_16 = arith.constant dense<0.000000e+00> : vector<32x64xf32>
    %45 = tpu.matmul %44, %43, %cst_16 {dimension_numbers = #tpu.dot_dimension_numbers<[1], [1], [0], [0], [0, 0, 1, 0], [], []>} : vector<32x64xf32>, vector<64x64xf32>, vector<32x64xf32> -> vector<32x64xf32>
    %46 = vector.extract_strided_slice %35 {offsets = [192, 0], sizes = [64, 64], strides = [1, 1]} : vector<256x64xf32> to vector<64x64xf32>
    %47 = vector.extract_strided_slice %9 {offsets = [96, 64], sizes = [32, 64], strides = [1, 1]} : vector<128x128xf32> to vector<32x64xf32>
    %cst_17 = arith.constant dense<0.000000e+00> : vector<32x64xf32>
    %48 = tpu.matmul %47, %46, %cst_17 {dimension_numbers = #tpu.dot_dimension_numbers<[1], [1], [0], [0], [0, 0, 1, 0], [], []>} : vector<32x64xf32>, vector<64x64xf32>, vector<32x64xf32> -> vector<32x64xf32>
    %49 = tpu.concatenate %45, %48 in 1 : vector<32x64xf32>, vector<32x64xf32> -> vector<32x128xf32>
    %50 = tpu.concatenate %42, %49 in 0 : vector<32x128xf32>, vector<32x128xf32> -> vector<64x128xf32>
    %cst_18 = arith.constant 0.000000e+00 : f32
    %51 = vector.broadcast %cst_18 : f32 to vector<64x128xf32>
    %52 = arith.maximumf %50, %51 : vector<64x128xf32>
    %c0_19 = arith.constant 0 : index
    %c0_20 = arith.constant 0 : index
    %53 = vector.load %arg4[%c0_19, %c0_20] : memref<32x64xf32, #tpu.memory_space<vmem>>, vector<32x64xf32>
    %cst_21 = arith.constant dense<0.000000e+00> : vector<32x128xf32>
    %54 = tpu.matmul %53, %52, %cst_21 {dimension_numbers = #tpu.dot_dimension_numbers<[1], [0], [0], [1], [0, 0, 1, 1], [], []>} : vector<32x64xf32>, vector<64x128xf32>, vector<32x128xf32> -> vector<32x128xf32>
    %c0_22 = arith.constant 0 : index
    %c0_23 = arith.constant 0 : index
    %55 = vector.load %arg5[%c0_22, %c0_23] : memref<32x1xf32, #tpu.memory_space<vmem>>, vector<32x1xf32>
    %56 = vector.broadcast %55 : vector<32x1xf32> to vector<32x128xf32>
    %57 = arith.addf %54, %56 : vector<32x128xf32>
    %c0_24 = arith.constant 0 : index
    %c0_25 = arith.constant 0 : index
    %58 = vector.load %arg6[%c0_24, %c0_25] : memref<32x128xf32, #tpu.memory_space<vmem>>, vector<32x128xf32>
    tpu.vector_store %arg6[%c0_24, %c0_25], %57 {strides = array<i32>} : memref<32x128xf32, #tpu.memory_space<vmem>>, vector<32x128xf32>,
    return
  }
  func.func @transform_0(%arg0: i32) -> (i32, i32, i32) {
    %c0_i32 = arith.constant 0 : i32
    %c0_i32_0 = arith.constant 0 : i32
    %c0_i32_1 = arith.constant 0 : i32
    %c0_i32_2 = arith.constant 0 : i32
    return %c0_i32, %c0_i32_0, %c0_i32_1 : i32, i32, i32
  }
  func.func @transform_1(%arg0: i32) -> (i32, i32) {
    %c0_i32 = arith.constant 0 : i32
    %c0_i32_0 = arith.constant 0 : i32
    %c0_i32_1 = arith.constant 0 : i32
    return %c0_i32, %c0_i32_0 : i32, i32
  }
  func.func @transform_2(%arg0: i32) -> (i32, i32) {
    %c0_i32 = arith.constant 0 : i32
    %c0_i32_0 = arith.constant 0 : i32
    %c0_i32_1 = arith.constant 0 : i32
    return %c0_i32, %c0_i32_0 : i32, i32
  }
  func.func @transform_3(%arg0: i32) -> (i32, i32) {
    %c0_i32 = arith.constant 0 : i32
    %c0_i32_0 = arith.constant 0 : i32
    %c0_i32_1 = arith.constant 0 : i32
    return %c0_i32, %c0_i32_0 : i32, i32
  }
  func.func @transform_4(%arg0: i32) -> (i32, i32) {
    %c0_i32 = arith.constant 0 : i32
    %c0_i32_0 = arith.constant 0 : i32
    %c0_i32_1 = arith.constant 0 : i32
    return %c0_i32, %c0_i32_0 : i32, i32
  }
  func.func @transform_5(%arg0: i32) -> (i32, i32) {
    %c0_i32 = arith.constant 0 : i32
    %c0_i32_0 = arith.constant 0 : i32
    %c0_i32_1 = arith.constant 0 : i32
    return %c0_i32, %c0_i32_0 : i32, i32
  }
}

</mosaic_0001>

<bundles_post_ra>
// kernel: attention_forward.1
= control target key start
LH: loop header
LB: loop body
LE: loop exit
PB: predicated region body
PF: predicated region fallthrough
CT: control target
= control target key end

     0   :  { %s2625_s22 = smov 64   ;;  %vm162_vm0 = vcmask 261120   ;;  %v2626_v5 = vmov 0   ;;  %vm45_vm1 = vcmask 523264   ;;  %vm388_vm2 = vcmask 130048   ;;  %s3428_s0 = inlined_call_operand.vmem [shape: f32[2,32,64], index: 0, kind: input, shape index: {}]   ;;  %s3429_s1 = inlined_call_operand.vmem [shape: f32[128,32], index: 1, kind: input, shape index: {}]   ;;  %s3430_s2 = inlined_call_operand.vmem [shape: f32[128,1], index: 2, kind: input, shape index: {}]   ;;  %s3431_s3 = inlined_call_operand.vmem [shape: f32[32,64], index: 3, kind: input, shape index: {}]   ;;  %s3432_s4 = inlined_call_operand.vmem [shape: f32[32,1], index: 4, kind: input, shape index: {}]   ;;  %s3433_s5 = inlined_call_operand.vmem [shape: f32[32,128], index: 5, kind: output, shape index: {}]  }
   0x1   :  { %v2061_v0 = vld [vmem:[%s3428_s0 + $0x38] sm:$0xff]  ;;  %v2059_v1 = vld [vmem:[%s3428_s0 + $0x28] sm:$0xff]  ;;  %v2060_v2 = vld [vmem:[%s3428_s0 + $0x30] sm:$0xff]  ;;  %2496 = vset.pattern.permute.xlu1 %v2626_v5  ;;  %2495 = vset.pattern.permute.xlu0 %v2626_v5 }
   0x2   :  { %39 = vrot.lane.b32.xlu0 %v2061_v0, %s2625_s22  ;;  %35 = vrot.lane.b32.xlu1 %v2059_v1, %s2625_s22  ;;  %v2058_v3 = vld [vmem:[%s3428_s0 + $0x20] sm:$0xff]  ;;  %v67_v6 = vld [vmem:[%s3430_s2 + $0x8] sm:$0xff] }
   0x3   :  { %v50_v4 = vld [vmem:[%s3429_s1] sm:$0xff]  ;;  %v68_v8 = vld [vmem:[%s3430_s2 + $0x10] sm:$0xff]  ;;  %v71_v9 = vld [vmem:[%s3430_s2 + $0x28] sm:$0xff] }
   0x4   :  { %2290 = vmatprep.mubr.msk.f32.mxu0 %vm162_vm0, %v50_v4  ;;  %v66_v7 = vld [vmem:[%s3430_s2] sm:$0xff]  ;;  %v69_v10 = vld [vmem:[%s3430_s2 + $0x18] sm:$0xff]  ;;  %v72_v13 = vld [vmem:[%s3430_s2 + $0x30] sm:$0xff] }
   0x5   :  { %v70_v11 = vld [vmem:[%s3430_s2 + $0x20] sm:$0xff]  ;;  %v73_v12 = vld [vmem:[%s3430_s2 + $0x38] sm:$0xff]  ;;  %v22_v18 = vld [vmem:[%s3428_s0 + $0x10] sm:$0xff] }
   0x6   :  { %37 = vrot.lane.b32.xlu0 %v2060_v2, %s2625_s22  ;;  %33 = vrot.lane.b32.xlu1 %v2058_v3, %s2625_s22  ;;  %v23_v14 = vld [vmem:[%s3428_s0 + $0x18] sm:$0xff]  ;;  %v21_v21 = vld [vmem:[%s3428_s0 + $0x8] sm:$0xff] }
   0x7   :  { %v20_v22 = vld [vmem:[%s3428_s0] sm:$0xff]  ;;  %v51_v26 = vld [vmem:[%s3429_s1 + $0x8] sm:$0xff]  ;;  %v52_v27 = vld [vmem:[%s3429_s1 + $0x10] sm:$0xff] }
   0x8   :  { %v53_v28 = vld [vmem:[%s3429_s1 + $0x18] sm:$0xff]  ;;  %v54_v29 = vld [vmem:[%s3429_s1 + $0x20] sm:$0xff]  ;;  %v55_v30 = vld [vmem:[%s3429_s1 + $0x28] sm:$0xff] }
   0x9   :  { %v56_v31 = vld [vmem:[%s3429_s1 + $0x30] sm:$0xff]  ;;  %v57_v32 = vld [vmem:[%s3429_s1 + $0x38] sm:$0xff]  ;;  %v58_v33 = vld [vmem:[%s3429_s1 + $0x40] sm:$0xff] }
   0xa   :  { %89 = vperm.xlu1 %2496, %v67_v6   ;;  %84 = vperm.xlu0 %2495, %v66_v7   ;;  %v59_v34 = vld [vmem:[%s3429_s1 + $0x48] sm:$0xff]  ;;  %v60_v35 = vld [vmem:[%s3429_s1 + $0x50] sm:$0xff]  ;;  %v61_v36 = vld [vmem:[%s3429_s1 + $0x58] sm:$0xff] }
   0xb   :  { %v62_v37 = vld [vmem:[%s3429_s1 + $0x60] sm:$0xff]  ;;  %v63_v38 = vld [vmem:[%s3429_s1 + $0x68] sm:$0xff]  ;;  %v64_v40 = vld [vmem:[%s3429_s1 + $0x70] sm:$0xff] }
   0xc   :  { %v65_v41 = vld [vmem:[%s3429_s1 + $0x78] sm:$0xff] }
   0xe   :  { %94 = vperm.xlu1 %2496, %v68_v8   ;;  %109 = vperm.xlu0 %2495, %v71_v9  }
  0x12   :  { %99 = vperm.xlu1 %2496, %v69_v10   ;;  %104 = vperm.xlu0 %2495, %v70_v11  }
  0x16   :  { %119 = vperm.xlu1 %2496, %v73_v12  }
  0x1a   :  { %114 = vperm.xlu1 %2496, %v72_v13  }
  0x74   :  { %v40_v15 = vpop.permute.xlu0 %39  ;;  %v36_v16 = vpop.permute.xlu1 %35 }
  0x75   :  { %v49_v17 = vsel %vm45_vm1, %v23_v14, %v40_v15  ;;  %v47_v24 = vsel %vm45_vm1, %v21_v21, %v36_v16  ;;  %v75_v16 = vld [vmem:[%s3430_s2 + $0x48] sm:$0xff] }
  0x76   :  { %2282 = vmatprep.subr.mxu0 %v49_v17 }
  0x77   :  { %2283 = vmatpush3.msra.mxu0 %v49_v17 }
  0x78   :  { %v38_v19 = vpop.permute.xlu0 %37  ;;  %v34_v20 = vpop.permute.xlu1 %33 }
  0x79   :  { %v48_v23 = vsel %vm45_vm1, %v22_v18, %v38_v19  ;;  %v46_v25 = vsel %vm45_vm1, %v20_v22, %v34_v20  ;;  %v76_v18 = vld [vmem:[%s3430_s2 + $0x50] sm:$0xff]  ;;  %v78_v20 = vld [vmem:[%s3430_s2 + $0x60] sm:$0xff] }
  0x7a   :  { %2284 = vmatprep.subr.mxu0 %v48_v23  ;;  %v80_v22 = vld [vmem:[%s3430_s2 + $0x70] sm:$0xff] }
  0x7b   :  { %2285 = vmatpush3.msra.mxu0 %v48_v23 }
  0x7c   :  { %2286 = vmatprep.subr.mxu0 %v47_v24 }
  0x7d   :  { %2287 = vmatpush3.msra.mxu0 %v47_v24 }
  0x7e   :  { %2288 = vmatprep.subr.mxu0 %v46_v25 }
  0x7f   :  { %2289 = vmatpush3.msra.mxu0 %v46_v25 }
  0x80   :  { %2291 = vmatmul.mubr.msk.f32.vlgmr.msra.gmra.mxu0 %vm162_vm0, %v51_v26 }
  0x81   :  { %2293 = vmatprep.mubr.msk.f32.mxu0 %vm162_vm0, %v52_v27  ;;  %v74_v27 = vld [vmem:[%s3430_s2 + $0x40] sm:$0xff] }
  0x84   :  { %2294 = vmatmul.mubr.msk.f32.gmra.mxu0 %vm162_vm0, %v53_v28  ;;  %v77_v28 = vld [vmem:[%s3430_s2 + $0x58] sm:$0xff] }
  0x85   :  { %2296 = vmatprep.mubr.msk.f32.mxu0 %vm162_vm0, %v54_v29  ;;  %v90_v39 = vpop.permute.xlu1 %89  ;;  %v85_v42 = vpop.permute.xlu0 %84  ;;  %v79_v29 = vld [vmem:[%s3430_s2 + $0x68] sm:$0xff] }
  0x88   :  { %2297 = vmatmul.mubr.msk.f32.gmra.mxu0 %vm162_vm0, %v55_v30  ;;  %v81_v30 = vld [vmem:[%s3430_s2 + $0x78] sm:$0xff] }
  0x89   :  { %2299 = vmatprep.mubr.msk.f32.mxu0 %vm162_vm0, %v56_v31  ;;  %v95_v43 = vpop.permute.xlu1 %94  ;;  %v110_v48 = vpop.permute.xlu0 %109 }
  0x8c   :  { %2300 = vmatmul.mubr.msk.f32.gmra.mxu0 %vm162_vm0, %v57_v32 }
  0x8d   :  { %2302 = vmatprep.mubr.msk.f32.mxu0 %vm162_vm0, %v58_v33  ;;  %v100_v50 = vpop.permute.xlu1 %99  ;;  %v105_v54 = vpop.permute.xlu0 %104 }
  0x90   :  { %2303 = vmatmul.mubr.msk.f32.gmra.mxu0 %vm162_vm0, %v59_v34 }
  0x91   :  { %2305 = vmatprep.mubr.msk.f32.mxu0 %vm162_vm0, %v60_v35  ;;  %v120_v58 = vpop.permute.xlu1 %119 }
  0x94   :  { %2306 = vmatmul.mubr.msk.f32.gmra.mxu0 %vm162_vm0, %v61_v36 }
  0x95   :  { %2308 = vmatprep.mubr.msk.f32.mxu0 %vm162_vm0, %v62_v37  ;;  %v115_v0 = vpop.permute.xlu1 %114 }
  0x98   :  { %2309 = vmatmul.mubr.msk.f32.gmra.mxu0 %vm162_vm0, %v63_v38 }
  0x99   :  { %2311 = vmatprep.mubr.msk.f32.mxu0 %vm162_vm0, %v64_v40 }
  0x9c   :  { %2312 = vmatmul.mubr.msk.f32.gmra.mxu0 %vm162_vm0, %v65_v41 }
 0x140   :  { %v2292_v44 = vpop.f32.mrf.mxu0 }
 0x141   :  { %v283_v45 = vadd.f32 %v2292_v44, %v90_v39 }
 0x142   :  { %v277_v46 = vpop.f32.mrf.mxu0 }
 0x143   :  { %v278_v47 = vadd.f32 %v277_v46, %v85_v42  ;;  %683 = vrot.lane.b32.xlu0 %v283_v45, %s2625_s22 }
 0x144   :  { %v2295_v49 = vpop.f32.mrf.mxu0 }
 0x145   :  { %356 = vxpose.xlu1.b32.start [1/2] (short) (narrow) %v278_v47, 64  ;;  %v293_v55 = vadd.f32 %v2295_v49, %v100_v50 }
 0x146   :  { %v287_v51 = vpop.f32.mrf.mxu0 }
 0x147   :  { %681 = vrot.lane.b32.xlu0 %v278_v47, %s2625_s22  ;;  %v288_v61 = vadd.f32 %v287_v51, %v95_v43 }
 0x148   :  { %v2298_v52 = vpop.f32.mrf.mxu0 }
 0x149   :  { %v303_v53 = vadd.f32 %v2298_v52, %v110_v48  ;;  %357 = vxpose.xlu1.b32.end [2/2] (short) (narrow) %v283_v45, 64 }
 0x14a   :  { %v297_v56 = vpop.f32.mrf.mxu0 }
 0x14b   :  { %v298_v57 = vadd.f32 %v297_v56, %v105_v54  ;;  %2314 = vmatprep.subr.mxu0 %v303_v53  ;;  %2488 = vmatprep.subr.mxu1 %v303_v53 }
 0x14c   :  { %860 = vrot.lane.b32.xlu0 %v293_v55, %s2625_s22  ;;  %v2301_v59 = vpop.f32.mrf.mxu0  ;;  %2315 = vmatpush3.msra.mxu0 %v303_v53 }
 0x14d   :  { %v313_v60 = vadd.f32 %v2301_v59, %v120_v58  ;;  %2490 = vmatpush3.msra.mxu1 %v303_v53  ;;  %2316 = vmatprep.subr.mxu0 %v298_v57 }
 0x14e   :  { %2489 = vmatprep.subr.mxu1 %v298_v57  ;;  %2317 = vmatpush3.msra.mxu0 %v298_v57  ;;  %v307_v5 = vpop.f32.mrf.mxu0 }
 0x14f   :  { %2491 = vmatpush3.msra.mxu1 %v298_v57  ;;  %v308_v8 = vadd.f32 %v307_v5, %v115_v0 }
 0x150   :  { %2330 = vmatprep.subr.mxu1 %v313_v60  ;;  %858 = vrot.lane.b32.xlu0 %v288_v61, %s2625_s22  ;;  %v2834_v46 = vpop.f32.mrf.mxu0 }
 0x152   :  { %v317_v48 = vpop.f32.mrf.mxu0 }
 0x154   :  { %723 = vrot.lane.b32.xlu0 %v303_v53, %s2625_s22  ;;  %v2840_v50 = vpop.f32.mrf.mxu0 }
 0x156   :  { %v2844_v51 = vpop.f32.mrf.mxu0 }
 0x158   :  { %721 = vrot.lane.b32.xlu0 %v298_v57, %s2625_s22  ;;  %v2847_v53 = vpop.f32.mrf.mxu0 }
 0x15a   :  { %v2849_v54 = vpop.f32.mrf.mxu0 }
 0x176   :  { %518 = vxpose.xlu0.b32.start [1/2] (short) (narrow) %v288_v61, 64 }
 0x17a   :  { %519 = vxpose.xlu0.b32.end [2/2] (short) (narrow) %v293_v55, 64  ;;  %v2851_v55 = vpop.f32.mrf.mxu0 }
 0x17c   :  { %v2853_v56 = vpop.f32.mrf.mxu0 }
 0x1b5   :  { %v684_v62 = vpop.permute.xlu0 %683 }
 0x1b9   :  { %v682_v63 = vpop.permute.xlu0 %681 }
 0x1ba   :  { %687 = vxpose.xlu1.b32.start [1/2] (short) (narrow) %v682_v63, 64 }
 0x1bb   :  { %900 = vrot.lane.b32.xlu0 %v313_v60, %s2625_s22 }
 0x1be   :  { %688 = vxpose.xlu1.b32.end [2/2] (short) (narrow) %v684_v62, 64  ;;  %v861_v2 = vpop.permute.xlu0 %860 }
 0x1c1   :  { %v372_v1 = vpop.trf.xlu1 }
 0x1c2   :  { %2318 = vmatprep.mubr.msk.f32.mxu0 %vm388_vm2, %v372_v1  ;;  %v859_v6 = vpop.permute.xlu0 %858 }
 0x1c5   :  { %v373_v3 = vpop.trf.xlu1 }
 0x1c6   :  { %2319 = vmatmul.mubr.msk.f32.vlgmr.msra.gmra.mxu0 %vm388_vm2, %v373_v3  ;;  %v724_v9 = vpop.permute.xlu0 %723 }
 0x1c9   :  { %v374_v4 = vpop.trf.xlu1 }
 0x1ca   :  { %2321 = vmatprep.mubr.msk.f32.mxu1 %vm388_vm2, %v374_v4  ;;  %v722_v14 = vpop.permute.xlu0 %721 }
 0x1cd   :  { %v375_v7 = vpop.trf.xlu1 }
 0x1ce   :  { %2322 = vmatmul.mubr.msk.f32.vlgmr.msra.gmra.mxu1 %vm388_vm2, %v375_v7 }
 0x1cf   :  { %2331 = vmatpush3.msra.mxu1 %v313_v60 }
 0x1d0   :  { %2332 = vmatprep.subr.mxu1 %v308_v8 }
 0x1d1   :  { %2333 = vmatpush3.msra.mxu1 %v308_v8  ;;  %v376_v10 = vpop.trf.xlu1 }
 0x1d2   :  { %2346 = vmatprep.subr.mxu1 %v724_v9  ;;  %2324 = vmatprep.mubr.msk.f32.mxu1 %vm388_vm2, %v376_v10 }
 0x1d5   :  { %v377_v11 = vpop.trf.xlu1 }
 0x1d6   :  { %2325 = vmatmul.mubr.msk.f32.gmra.mxu1 %vm388_vm2, %v377_v11 }
 0x1d9   :  { %864 = vxpose.xlu0.b32.start [1/2] (short) (narrow) %v859_v6, 64  ;;  %v378_v12 = vpop.trf.xlu1 }
 0x1da   :  { %2327 = vmatprep.mubr.msk.f32.mxu1 %vm388_vm2, %v378_v12 }
 0x1dd   :  { %865 = vxpose.xlu0.b32.end [2/2] (short) (narrow) %v861_v2, 64  ;;  %v379_v13 = vpop.trf.xlu1 }
 0x1de   :  { %2328 = vmatmul.mubr.msk.f32.gmra.mxu1 %vm388_vm2, %v379_v13 }
 0x1f2   :  { %v534_v15 = vpop.trf.xlu0 }
 0x1f3   :  { %2334 = vmatprep.mubr.msk.f32.mxu1 %vm388_vm2, %v534_v15 }
 0x1f4   :  { %898 = vrot.lane.b32.xlu1 %v308_v8, %s2625_s22 }
 0x1f6   :  { %v535_v17 = vpop.trf.xlu0 }
 0x1f7   :  { %2335 = vmatmul.mubr.msk.f32.vlgmr.msra.gmra.mxu1 %vm388_vm2, %v535_v17 }
 0x1f8   :  { %2347 = vmatpush3.msra.mxu1 %v724_v9  ;;  %129 = vperm.xlu1 %2496, %v75_v16  }
 0x1f9   :  { %2348 = vmatprep.subr.mxu1 %v722_v14 }
 0x1fa   :  { %2349 = vmatpush3.msra.mxu1 %v722_v14  ;;  %v536_v19 = vpop.trf.xlu0 }
 0x1fb   :  { %2337 = vmatprep.mubr.msk.f32.mxu1 %vm388_vm2, %v536_v19 }
 0x1fc   :  { %134 = vperm.xlu1 %2496, %v76_v18  }
 0x1fe   :  { %v537_v21 = vpop.trf.xlu0 }
 0x1ff   :  { %2338 = vmatmul.mubr.msk.f32.gmra.mxu1 %vm388_vm2, %v537_v21 }
 0x200   :  { %144 = vperm.xlu1 %2496, %v78_v20  }
 0x202   :  { %v538_v23 = vpop.trf.xlu0 }
 0x203   :  { %2340 = vmatprep.mubr.msk.f32.mxu1 %vm388_vm2, %v538_v23 }
 0x204   :  { %154 = vperm.xlu1 %2496, %v80_v22  }
 0x206   :  { %v539_v24 = vpop.trf.xlu0 }
 0x207   :  { %2341 = vmatmul.mubr.msk.f32.gmra.mxu1 %vm388_vm2, %v539_v24 }
 0x20a   :  { %v540_v25 = vpop.trf.xlu0 }
 0x20b   :  { %2343 = vmatprep.mubr.msk.f32.mxu1 %vm388_vm2, %v540_v25 }
 0x20e   :  { %v541_v26 = vpop.trf.xlu0 }
 0x20f   :  { %2344 = vmatmul.mubr.msk.f32.gmra.mxu1 %vm388_vm2, %v541_v26 }
 0x21e   :  { %124 = vperm.xlu0 %2495, %v74_v27  }
 0x222   :  { %139 = vperm.xlu0 %2495, %v77_v28  }
 0x226   :  { %149 = vperm.xlu0 %2495, %v79_v29  }
 0x22a   :  { %159 = vperm.xlu0 %2495, %v81_v30  }
 0x22d   :  { %v901_v31 = vpop.permute.xlu0 %900 }
 0x22e   :  { %2362 = vmatprep.subr.mxu0 %v901_v31 }
 0x22f   :  { %2363 = vmatpush3.msra.mxu0 %v901_v31 }
 0x236   :  { %v703_v32 = vpop.trf.xlu1 }
 0x237   :  { %2350 = vmatprep.mubr.msk.f32.mxu1 %vm388_vm2, %v703_v32 }
 0x23a   :  { %v704_v33 = vpop.trf.xlu1 }
 0x23b   :  { %2351 = vmatmul.mubr.msk.f32.vlgmr.msra.gmra.mxu1 %vm388_vm2, %v704_v33 }
 0x23e   :  { %v705_v34 = vpop.trf.xlu1 }
 0x23f   :  { %2353 = vmatprep.mubr.msk.f32.mxu1 %vm388_vm2, %v705_v34 }
 0x242   :  { %v706_v35 = vpop.trf.xlu1 }
 0x243   :  { %2354 = vmatmul.mubr.msk.f32.gmra.mxu1 %vm388_vm2, %v706_v35 }
 0x246   :  { %v707_v36 = vpop.trf.xlu1 }
 0x247   :  { %2356 = vmatprep.mubr.msk.f32.mxu1 %vm388_vm2, %v707_v36 }
 0x24a   :  { %v708_v37 = vpop.trf.xlu1 }
 0x24b   :  { %2357 = vmatmul.mubr.msk.f32.gmra.mxu1 %vm388_vm2, %v708_v37 }
 0x24e   :  { %v709_v38 = vpop.trf.xlu1 }
 0x24f   :  { %2359 = vmatprep.mubr.msk.f32.mxu1 %vm388_vm2, %v709_v38 }
 0x252   :  { %v710_v39 = vpop.trf.xlu1 }
 0x253   :  { %2360 = vmatmul.mubr.msk.f32.gmra.mxu1 %vm388_vm2, %v710_v39 }
 0x255   :  { %v880_v40 = vpop.trf.xlu0 }
 0x256   :  { %2366 = vmatprep.mubr.msk.f32.mxu0 %vm388_vm2, %v880_v40 }
 0x259   :  { %v881_v41 = vpop.trf.xlu0 }
 0x25d   :  { %v882_v42 = vpop.trf.xlu0 }
 0x261   :  { %v883_v43 = vpop.trf.xlu0 }
 0x265   :  { %v884_v44 = vpop.trf.xlu0 }
 0x266   :  { %v899_v45 = vpop.permute.xlu1 %898 }
 0x267   :  { %2364 = vmatprep.subr.mxu0 %v899_v45 }
 0x268   :  { %2365 = vmatpush3.msra.mxu0 %v899_v45 }
 0x269   :  { %2367 = vmatmul.mubr.msk.f32.vlgmr.msra.gmra.mxu0 %vm388_vm2, %v881_v41  ;;  %v885_v47 = vpop.trf.xlu0 }
 0x26a   :  { %2369 = vmatprep.mubr.msk.f32.mxu0 %vm388_vm2, %v882_v42 }
 0x26d   :  { %2370 = vmatmul.mubr.msk.f32.gmra.mxu0 %vm388_vm2, %v883_v43  ;;  %v886_v49 = vpop.trf.xlu0 }
 0x26e   :  { %2372 = vmatprep.mubr.msk.f32.mxu0 %vm388_vm2, %v884_v44 }
 0x271   :  { %2373 = vmatmul.mubr.msk.f32.gmra.mxu0 %vm388_vm2, %v885_v47  ;;  %v887_v52 = vpop.trf.xlu0 }
 0x272   :  { %2375 = vmatprep.mubr.msk.f32.mxu0 %vm388_vm2, %v886_v49 }
 0x273   :  { %v2921_v27 = vpop.permute.xlu1 %129 }
 0x275   :  { %2376 = vmatmul.mubr.msk.f32.gmra.mxu0 %vm388_vm2, %v887_v52 }
 0x277   :  { %v2933_v33 = vpop.permute.xlu1 %134 }
 0x27b   :  { %v2939_v36 = vpop.permute.xlu1 %144 }
 0x27f   :  { %v2947_v40 = vpop.permute.xlu1 %154 }
 0x286   :  { %v2855_v57 = vpop.f32.mrf.mxu0 }
 0x287   :  { %v1036_v58 = vsel %vm45_vm1, %v2855_v57, -inf }
 0x288   :  { %1037 = vmax.xlane.f32.xlu1 %v1036_v58  ;;  %v2859_v59 = vpop.f32.mrf.mxu0 }
 0x289   :  { %v1033_v60 = vsel %vm45_vm1, %v2859_v59, -inf }
 0x28c   :  { %1034 = vmax.xlane.f32.xlu1 %v1033_v60 }
 0x28e   :  { %v2863_v61 = vpop.f32.mrf.mxu1 }
 0x28f   :  { %v1042_v62 = vsel %vm45_vm1, %v2863_v61, -inf }
 0x290   :  { %1043 = vmax.xlane.f32.xlu1 %v1042_v62  ;;  %v2867_v63 = vpop.f32.mrf.mxu1 }
 0x291   :  { %v1039_v7 = vsel %vm45_vm1, %v2867_v63, -inf }
 0x296   :  { %v2869_v0 = vpop.f32.mrf.mxu1 }
 0x297   :  { %v1048_v1 = vsel %vm45_vm1, %v2869_v0, -inf }
 0x298   :  { %1049 = vmax.xlane.f32.xlu1 %v1048_v1  ;;  %v2873_v4 = vpop.f32.mrf.mxu1 }
 0x299   :  { %v125_v2 = vpop.permute.xlu0 %124  ;;  %v1045_v8 = vsel %vm45_vm1, %v2873_v4, -inf }
 0x29a   :  { %v318_v3 = vadd.f32 %v317_v48, %v125_v2 }
 0x29c   :  { %1506 = vrot.lane.b32.xlu0 %v318_v3, %s2625_s22  ;;  %2394 = vmatprep.mubr.msk.f32.mxu1 %vm45_vm1, %v318_v3 }
 0x29d   :  { %v2929_v31 = vpop.permute.xlu0 %139 }
 0x29e   :  { %v2877_v5 = vpop.f32.mrf.mxu1 }
 0x29f   :  { %v1054_v6 = vsel %vm45_vm1, %v2877_v5, -inf }
 0x2a0   :  { %1055 = vmax.xlane.f32.xlu1 %v1054_v6  ;;  %v2885_v9 = vpop.f32.mrf.mxu1 }
 0x2a1   :  { %v1051_v10 = vsel %vm45_vm1, %v2885_v9, -inf  ;;  %v2937_v35 = vpop.permute.xlu0 %149 }
 0x2a5   :  { %v2943_v38 = vpop.permute.xlu0 %159 }
 0x2b7   :  { %v2889_v11 = vpop.f32.mrf.mxu1 }
 0x2b8   :  { %v1060_v12 = vsel %vm45_vm1, %v2889_v11, -inf }
 0x2b9   :  { %v2893_v13 = vpop.f32.mrf.mxu1 }
 0x2ba   :  { %v1057_v14 = vsel %vm45_vm1, %v2893_v13, -inf }
 0x2bb   :  { %1040 = vmax.xlane.f32.xlu0 %v1039_v7 }
 0x2bf   :  { %1046 = vmax.xlane.f32.xlu0 %v1045_v8  ;;  %v2897_v15 = vpop.f32.mrf.mxu1 }
 0x2c0   :  { %v1066_v16 = vsel %vm45_vm1, %v2897_v15, -inf }
 0x2c1   :  { %v2901_v17 = vpop.f32.mrf.mxu1 }
 0x2c2   :  { %v1063_v18 = vsel %vm45_vm1, %v2901_v17, -inf }
 0x2c3   :  { %1052 = vmax.xlane.f32.xlu0 %v1051_v10 }
 0x2c7   :  { %1061 = vmax.xlane.f32.xlu0 %v1060_v12  ;;  %v2905_v19 = vpop.f32.mrf.mxu1 }
 0x2c8   :  { %v1072_v20 = vsel %vm45_vm1, %v2905_v19, -inf }
 0x2c9   :  { %v2909_v21 = vpop.f32.mrf.mxu1 }
 0x2ca   :  { %v1069_v22 = vsel %vm45_vm1, %v2909_v21, -inf }
 0x2cb   :  { %1058 = vmax.xlane.f32.xlu0 %v1057_v14 }
 0x2cf   :  { %1067 = vmax.xlane.f32.xlu0 %v1066_v16  ;;  %v2913_v23 = vpop.f32.mrf.mxu1 }
 0x2d0   :  { %v1078_v24 = vsel %vm45_vm1, %v2913_v23, -inf }
 0x2d1   :  { %v2917_v25 = vpop.f32.mrf.mxu1 }
 0x2d2   :  { %v1075_v26 = vsel %vm45_vm1, %v2917_v25, -inf }
 0x2d3   :  { %1064 = vmax.xlane.f32.xlu0 %v1063_v18 }
 0x2d7   :  { %1073 = vmax.xlane.f32.xlu0 %v1072_v20 }
 0x2db   :  { %1070 = vmax.xlane.f32.xlu0 %v1069_v22 }
 0x2df   :  { %1079 = vmax.xlane.f32.xlu0 %v1078_v24 }
 0x2e3   :  { %1076 = vmax.xlane.f32.xlu0 %v1075_v26 }
 0x2fb   :  { %v2923_v28 = vpop.f32.mrf.mxu1 }
 0x2fc   :  { %v1084_v29 = vsel %vm45_vm1, %v2923_v28, -inf }
 0x2fd   :  { %1085 = vmax.xlane.f32.xlu1 %v1084_v29  ;;  %v2927_v30 = vpop.f32.mrf.mxu1 }
 0x2fe   :  { %v1081_v32 = vsel %vm45_vm1, %v2927_v30, -inf }
 0x301   :  { %1082 = vmax.xlane.f32.xlu1 %v1081_v32 }
 0x303   :  { %v2935_v34 = vpop.f32.mrf.mxu1 }
 0x304   :  { %v1090_v3 = vsel %vm45_vm1, %v2935_v34, -inf }
 0x305   :  { %v2941_v37 = vpop.f32.mrf.mxu1 }
 0x306   :  { %v1087_v6 = vsel %vm45_vm1, %v2941_v37, -inf }
 0x30b   :  { %v2945_v39 = vpop.f32.mrf.mxu1 }
 0x30c   :  { %v1096_v18 = vsel %vm45_vm1, %v2945_v39, -inf }
 0x30d   :  { %v2950_v42 = vpop.f32.mrf.mxu1 }
 0x30e   :  { %v1507_v41 = vpop.permute.xlu0 %1506  ;;  %v1093_v26 = vsel %vm45_vm1, %v2950_v42, -inf }
 0x30f   :  { %2416 = vmatprep.mubr.msk.f32.mxu0 %vm45_vm1, %v1507_v41 }
 0x311   :  { %v2952_v43 = vpop.xlane.xlu1 %1037 }
 0x313   :  { %v2954_v44 = vpop.f32.mrf.mxu1 }
 0x315   :  { %v1035_v45 = vpop.xlane.xlu1 %1034  ;;  %v2956_v47 = vpop.f32.mrf.mxu1 }
 0x316   :  { %v1129_v48 = vsub.f32 %v2859_v59, %v1035_v45  ;;  %v1099_v49 = vsel %vm45_vm1, %v2956_v47, -inf }
 0x317   :  { %1100 = vmax.xlane.f32.xlu0 %v1099_v49 }
 0x318   :  { %v1161_v52 = vmul.f32 1.442695, %v1129_v48 }
 0x319   :  { %v1044_v12 = vpop.xlane.xlu1 %1043 }
 0x31a   :  { %2497 = vpow2.f32 %v1161_v52 }
 0x321   :  { %v1050_v16 = vpop.xlane.xlu1 %1049 }
 0x322   :  { %v1134_v20 = vsub.f32 %v2869_v0, %v1050_v16 }
 0x324   :  { %v1171_v29 = vmul.f32 1.442695, %v1134_v20  ;;  %v3019_v20 = vadd.f32 %v2834_v46, %v2921_v27 }
 0x327   :  { %v2961_v58 = vpop.eup %2497 }
 0x328   :  { %v1225_v60 = vsel %vm45_vm1, %v2961_v58, 0.0 }
 0x329   :  { %v2965_v62 = vpop.f32.mrf.mxu0  ;;  %1226 = vadd.xlane.f32.xlu0 %v1225_v60  ;;  %v1056_v45 = vpop.xlane.xlu1 %1055 }
 0x32a   :  { %v1108_v1 = vsel %vm45_vm1, %v2965_v62, -inf  ;;  %v1136_v52 = vsub.f32 %v2877_v5, %v1056_v45 }
 0x32b   :  { %1109 = vmax.xlane.f32.xlu1 %v1108_v1  ;;  %v2969_v2 = vpop.f32.mrf.mxu0 }
 0x32c   :  { %v1105_v59 = vsel %vm45_vm1, %v2969_v2, -inf }
 0x32d   :  { %v2977_v7 = vpop.f32.mrf.mxu0 }
 0x32e   :  { %v1114_v8 = vsel %vm45_vm1, %v2977_v7, -inf }
 0x32f   :  { %1106 = vmax.xlane.f32.xlu1 %v1105_v59  ;;  %v2981_v10 = vpop.f32.mrf.mxu0  ;;  %v1175_v59 = vmul.f32 1.442695, %v1136_v52 }
 0x330   :  { %v1111_v14 = vsel %vm45_vm1, %v2981_v10, -inf }
 0x331   :  { %v2991_v41 = vpop.f32.mrf.mxu0 }
 0x332   :  { %v1120_v49 = vsel %vm45_vm1, %v2991_v41, -inf }
 0x333   :  { %1091 = vmax.xlane.f32.xlu1 %v1090_v3  ;;  %v2997_v60 = vpop.f32.mrf.mxu0  ;;  %v1102_v3 = vsel %vm45_vm1, %v2954_v44, -inf }
 0x334   :  { %v1117_v1 = vsel %vm45_vm1, %v2997_v60, -inf }
 0x335   :  { %v3029_v27 = vpop.f32.mrf.mxu0 }
 0x337   :  { %1088 = vmax.xlane.f32.xlu1 %v1087_v6 }
 0x33b   :  { %1115 = vmax.xlane.f32.xlu1 %v1114_v8 }
 0x33f   :  { %1112 = vmax.xlane.f32.xlu1 %v1111_v14 }
 0x343   :  { %1097 = vmax.xlane.f32.xlu1 %v1096_v18 }
 0x344   :  { %v1041_v22 = vpop.xlane.xlu0 %1040 }
 0x345   :  { %v1131_v24 = vsub.f32 %v2867_v63, %v1041_v22 }
 0x347   :  { %v1165_v32 = vmul.f32 1.442695, %v1131_v24  ;;  %1094 = vmax.xlane.f32.xlu1 %v1093_v26  ;;  %v1130_v24 = vsub.f32 %v2855_v57, %v2952_v43  ;;  %v3034_v57 = vpop.f32.mrf.mxu0 }
 0x348   :  { %v1047_v48 = vpop.xlane.xlu0 %1046 }
 0x349   :  { %2499 = vpow2.f32 %v1165_v32  ;;  %v1133_v0 = vsub.f32 %v2873_v4, %v1047_v48  ;;  %v1163_v26 = vmul.f32 1.442695, %v1130_v24 }
 0x34a   :  { %2501 = vpow2.f32 %v1171_v29  ;;  %v1132_v29 = vsub.f32 %v2863_v61, %v1044_v12 }
 0x34b   :  { %v1169_v63 = vmul.f32 1.442695, %v1133_v0  ;;  %1121 = vmax.xlane.f32.xlu1 %v1120_v49  ;;  %v1126_v49 = vsel %vm45_vm1, %v3029_v27, -inf }
 0x34c   :  { %v1053_v32 = vpop.xlane.xlu0 %1052  ;;  %v1167_v45 = vmul.f32 1.442695, %v1132_v29 }
 0x34d   :  { %2503 = vpow2.f32 %v1169_v63  ;;  %v1135_v48 = vsub.f32 %v2885_v9, %v1053_v32  ;;  %v1123_v9 = vsel %vm45_vm1, %v3034_v57, -inf }
 0x34e   :  { %2505 = vpow2.f32 %v1175_v59 }
 0x34f   :  { %1118 = vmax.xlane.f32.xlu1 %v1117_v1  ;;  %2507 = vpow2.f32 %v1163_v26  ;;  %v1173_v46 = vmul.f32 1.442695, %v1135_v48 }
 0x350   :  { %2509 = vpow2.f32 %v1167_v45  ;;  %v3059_v26 = vpop.xlane.xlu0 %1061 }
 0x351   :  { %2511 = vpow2.f32 %v1173_v46 }
 0x353   :  { %1103 = vmax.xlane.f32.xlu1 %v1102_v3 }
 0x354   :  { %v3061_v29 = vpop.xlane.xlu0 %1058 }
 0x356   :  { %v3003_v6 = vpop.eup %2499 }
 0x357   :  { %v1231_v4 = vsel %vm45_vm1, %v3003_v6, 0.0  ;;  %v3007_v5 = vpop.eup %2501 }
 0x358   :  { %1232 = vadd.xlane.f32.xlu0 %v1231_v4  ;;  %v1240_v8 = vsel %vm45_vm1, %v3007_v5, 0.0  ;;  %v3063_v32 = vpop.xlane.xlu0 %1067 }
 0x35a   :  { %v3011_v14 = vpop.eup %2503 }
 0x35b   :  { %v1237_v16 = vsel %vm45_vm1, %v3011_v14, 0.0  ;;  %v3015_v18 = vpop.eup %2505 }
 0x35c   :  { %1241 = vadd.xlane.f32.xlu0 %v1240_v8  ;;  %v1246_v22 = vsel %vm45_vm1, %v3015_v18, 0.0  ;;  %v3039_v63 = vpop.eup %2507  ;;  %v3065_v45 = vpop.xlane.xlu0 %1064 }
 0x35d   :  { %v1228_v59 = vsel %vm45_vm1, %v3039_v63, 0.0 }
 0x360   :  { %1238 = vadd.xlane.f32.xlu0 %v1237_v16 }
 0x364   :  { %1247 = vadd.xlane.f32.xlu0 %v1246_v22  ;;  %1508 = vrot.lane.b32.xlu1 %v3019_v20, %s2625_s22 }
 0x386   :  { %v1086_v0 = vpop.xlane.xlu1 %1085 }
 0x387   :  { %v1146_v52 = vsub.f32 %v2923_v28, %v1086_v0  ;;  %v3043_v28 = vpop.eup %2509 }
 0x388   :  { %1127 = vmax.xlane.f32.xlu1 %v1126_v49  ;;  %v1234_v3 = vsel %vm45_vm1, %v3043_v28, 0.0  ;;  %v3047_v4 = vpop.eup %2511 }
 0x389   :  { %v1195_v61 = vmul.f32 1.442695, %v1146_v52 }
 0x38a   :  { %v1083_v43 = vpop.xlane.xlu1 %1082 }
 0x38b   :  { %2513 = vpow2.f32 %v1195_v61  ;;  %v1145_v12 = vsub.f32 %v2927_v30, %v1083_v43  ;;  %v1243_v30 = vsel %vm45_vm1, %v3047_v4, 0.0  ;;  %v3069_v61 = vpop.xlane.xlu0 %1073 }
 0x38c   :  { %1124 = vmax.xlane.f32.xlu1 %v1123_v9 }
 0x38d   :  { %v1193_v1 = vmul.f32 1.442695, %v1145_v12 }
 0x38f   :  { %2515 = vpow2.f32 %v1193_v1 }
 0x390   :  { %1229 = vadd.xlane.f32.xlu1 %v1228_v59  ;;  %v3072_v59 = vpop.xlane.xlu0 %1070 }
 0x394   :  { %1235 = vadd.xlane.f32.xlu1 %v1234_v3 }
 0x398   :  { %v3051_v8 = vpop.eup %2513  ;;  %1244 = vadd.xlane.f32.xlu1 %v1243_v30 }
 0x399   :  { %v1276_v16 = vsel %vm45_vm1, %v3051_v8, 0.0 }
 0x39c   :  { %v3055_v22 = vpop.eup %2515  ;;  %1277 = vadd.xlane.f32.xlu1 %v1276_v16 }
 0x39d   :  { %v1273_v24 = vsel %vm45_vm1, %v3055_v22, 0.0 }
 0x3a0   :  { %1274 = vadd.xlane.f32.xlu1 %v1273_v24 }
 0x3b4   :  { %v1110_v48 = vpop.xlane.xlu1 %1109 }
 0x3b5   :  { %v1154_v46 = vsub.f32 %v2965_v62, %v1110_v48  ;;  %v3078_v48 = vpop.xlane.xlu0 %1079 }
 0x3b7   :  { %v1211_v49 = vmul.f32 1.442695, %v1154_v46 }
 0x3b8   :  { %v1107_v0 = vpop.xlane.xlu1 %1106 }
 0x3b9   :  { %2517 = vpow2.f32 %v1211_v49  ;;  %v1153_v52 = vsub.f32 %v2969_v2, %v1107_v0 }
 0x3bb   :  { %v1209_v43 = vmul.f32 1.442695, %v1153_v52 }
 0x3bc   :  { %v1092_v12 = vpop.xlane.xlu1 %1091 }
 0x3bd   :  { %2519 = vpow2.f32 %v1209_v43  ;;  %v1148_v9 = vsub.f32 %v2935_v34, %v1092_v12 }
 0x3bf   :  { %v1199_v1 = vmul.f32 1.442695, %v1148_v9 }
 0x3c0   :  { %v1089_v3 = vpop.xlane.xlu1 %1088 }
 0x3c1   :  { %2521 = vpow2.f32 %v1199_v1  ;;  %v1147_v30 = vsub.f32 %v2941_v37, %v1089_v3 }
 0x3c3   :  { %v1197_v62 = vmul.f32 1.442695, %v1147_v30 }
 0x3c4   :  { %v1116_v16 = vpop.xlane.xlu1 %1115 }
 0x3c5   :  { %2523 = vpow2.f32 %v1197_v62  ;;  %v1156_v24 = vsub.f32 %v2977_v7, %v1116_v16  ;;  %v3087_v7 = vpop.xlane.xlu0 %1076 }
 0x3c6   :  { %v3076_v2 = vpop.eup %2517 }
 0x3c7   :  { %3436 = vst [vmem:[#allocation2_spill] sm:$0xff] %v3076_v2  ;;  %v1215_v46 = vmul.f32 1.442695, %v1156_v24  ;;  %v1300_v34 = vsel %vm45_vm1, %v3076_v2, 0.0 }
 0x3c8   :  { %v1113_v49 = vpop.xlane.xlu1 %1112  ;;  %1301 = vadd.xlane.f32.xlu1 %v1300_v34 }
 0x3c9   :  { %2525 = vpow2.f32 %v1215_v46  ;;  %v1155_v0 = vsub.f32 %v2981_v10, %v1113_v49  ;;  %v1101_v10 = vpop.xlane.xlu0 %1100 }
 0x3ca   :  { %v3083_v52 = vpop.eup %2519  ;;  %v1151_v46 = vsub.f32 %v2956_v47, %v1101_v10 }
 0x3cb   :  { %3437 = vst [vmem:[#allocation3_spill] sm:$0xff] %v3083_v52  ;;  %v1213_v37 = vmul.f32 1.442695, %v1155_v0  ;;  %v1297_v43 = vsel %vm45_vm1, %v3083_v52, 0.0 }
 0x3cc   :  { %v1098_v12 = vpop.xlane.xlu1 %1097  ;;  %1298 = vadd.xlane.f32.xlu1 %v1297_v43  ;;  %v1205_v43 = vmul.f32 1.442695, %v1151_v46 }
 0x3cd   :  { %2527 = vpow2.f32 %v1213_v37  ;;  %v1150_v9 = vsub.f32 %v2945_v39, %v1098_v12 }
 0x3ce   :  { %v3090_v1 = vpop.eup %2521 }
 0x3cf   :  { %v1203_v3 = vmul.f32 1.442695, %v1150_v9  ;;  %v1282_v30 = vsel %vm45_vm1, %v3090_v1, 0.0 }
 0x3d0   :  { %v1095_v62 = vpop.xlane.xlu1 %1094  ;;  %1283 = vadd.xlane.f32.xlu1 %v1282_v30 }
 0x3d1   :  { %2529 = vpow2.f32 %v1203_v3  ;;  %v1149_v16 = vsub.f32 %v2950_v42, %v1095_v62  ;;  %v3110_v62 = vpop.xlane.xlu0 %1226 }
 0x3d2   :  { %v3095_v24 = vpop.eup %2523 }
 0x3d3   :  { %v1201_v34 = vmul.f32 1.442695, %v1149_v16  ;;  %v1279_v39 = vsel %vm45_vm1, %v3095_v24, 0.0 }
 0x3d4   :  { %v1122_v49 = vpop.xlane.xlu1 %1121  ;;  %1280 = vadd.xlane.f32.xlu1 %v1279_v39 }
 0x3d5   :  { %2531 = vpow2.f32 %v1201_v34  ;;  %v1158_v0 = vsub.f32 %v2991_v41, %v1122_v49 }
 0x3d6   :  { %v3101_v37 = vpop.eup %2525 }
 0x3d7   :  { %v1219_v12 = vmul.f32 1.442695, %v1158_v0  ;;  %v1306_v42 = vsel %vm45_vm1, %v3101_v37, 0.0 }
 0x3d8   :  { %v1119_v9 = vpop.xlane.xlu1 %1118  ;;  %1307 = vadd.xlane.f32.xlu1 %v1306_v42 }
 0x3d9   :  { %2533 = vpow2.f32 %v1219_v12  ;;  %v1157_v47 = vsub.f32 %v2997_v60, %v1119_v9 }
 0x3da   :  { %v3106_v3 = vpop.eup %2527  ;;  %2535 = vpow2.f32 %v1205_v43 }
 0x3db   :  { %v1217_v30 = vmul.f32 1.442695, %v1157_v47  ;;  %v1303_v10 = vsel %vm45_vm1, %v3106_v3, 0.0 }
 0x3dc   :  { %v1104_v41 = vpop.xlane.xlu1 %1103  ;;  %1304 = vadd.xlane.f32.xlu0 %v1303_v10 }
 0x3dd   :  { %2537 = vpow2.f32 %v1217_v30  ;;  %v1152_v16 = vsub.f32 %v2954_v44, %v1104_v41 }
 0x3de   :  { %v3113_v46 = vpop.eup %2529 }
 0x3df   :  { %v1207_v34 = vmul.f32 1.442695, %v1152_v16  ;;  %v1288_v60 = vsel %vm45_vm1, %v3113_v46, 0.0 }
 0x3e0   :  { %1289 = vadd.xlane.f32.xlu1 %v1288_v60 }
 0x3e1   :  { %2539 = vpow2.f32 %v1207_v34  ;;  %v1233_v39 = vpop.xlane.xlu0 %1232 }
 0x3e2   :  { %v3117_v49 = vpop.eup %2531 }
 0x3e3   :  { %v1285_v0 = vsel %vm45_vm1, %v3117_v49, 0.0 }
 0x3e4   :  { %1286 = vadd.xlane.f32.xlu1 %v1285_v0 }
 0x3e5   :  { %v1242_v43 = vpop.xlane.xlu0 %1241 }
 0x3e6   :  { %v3121_v12 = vpop.eup %2533 }
 0x3e7   :  { %v1312_v44 = vsel %vm45_vm1, %v3121_v12, 0.0  ;;  %v3125_v42 = vpop.eup %2535 }
 0x3e8   :  { %1313 = vadd.xlane.f32.xlu1 %v1312_v44  ;;  %v1291_v10 = vsel %vm45_vm1, %v3125_v42, 0.0  ;;  %v3142_v44 = vadd.f32 %v2840_v50, %v2929_v31 }
 0x3e9   :  { %v1239_v9 = vpop.xlane.xlu0 %1238 }
 0x3ea   :  { %v3127_v47 = vpop.eup %2537 }
 0x3eb   :  { %v1309_v30 = vsel %vm45_vm1, %v3127_v47, 0.0 }
 0x3ec   :  { %1310 = vadd.xlane.f32.xlu0 %v1309_v30  ;;  %1292 = vadd.xlane.f32.xlu1 %v1291_v10  ;;  %v3148_v30 = vadd.f32 %v2849_v54, %v2939_v36  ;;  %v3152_v10 = vpop.permute.xlu1 %1508 }
 0x3ed   :  { %v1248_v41 = vpop.xlane.xlu0 %1247 }
 0x3ee   :  { %v3133_v16 = vpop.eup %2539  ;;  %2541 = vrcp.f32 %v1248_v41 }
 0x3ef   :  { %v1294_v34 = vsel %vm45_vm1, %v3133_v16, 0.0 }
 0x3f0   :  { %1295 = vadd.xlane.f32.xlu0 %v1294_v34 }
 0x3fb   :  { %v2542_v60 = vpop.eup %2541 }
 0x3fc   :  { %v1336_v0 = vmul.f32 %v2542_v60, %v3015_v18 }
 0x3fe   :  { %2378 = vmatprep.subr.msk.mxu1 %vm45_vm1, %v1336_v0 }
 0x3ff   :  { %2379 = vmatpush3.xpose.msk.msra.mxu1 %vm45_vm1, %v1336_v0 }
 0x406   :  { %1512 = vrot.lane.b32.xlu0 %v3142_v44, %s2625_s22 }
 0x40a   :  { %1772 = vrot.lane.b32.xlu0 %v3148_v30, %s2625_s22 }
 0x411   :  { %v1128_v18 = vpop.xlane.xlu1 %1127 }
 0x412   :  { %v1160_v41 = vsub.f32 %v3029_v27, %v1128_v18 }
 0x414   :  { %v1223_v34 = vmul.f32 1.442695, %v1160_v41 }
 0x415   :  { %v1125_v60 = vpop.xlane.xlu1 %1124 }
 0x416   :  { %2543 = vpow2.f32 %v1223_v34  ;;  %v1159_v50 = vsub.f32 %v3034_v57, %v1125_v60 }
 0x418   :  { %v1221_v31 = vmul.f32 1.442695, %v1159_v50 }
 0x419   :  { %v1230_v0 = vpop.xlane.xlu1 %1229 }
 0x41a   :  { %2545 = vpow2.f32 %v1221_v31 }
 0x41b   :  { %2547 = vrcp.f32 %v1242_v43 }
 0x41d   :  { %v1236_v52 = vpop.xlane.xlu1 %1235 }
 0x421   :  { %v1245_v54 = vpop.xlane.xlu1 %1244 }
 0x422   :  { %2549 = vrcp.f32 %v1245_v54 }
 0x423   :  { %v3156_v36 = vpop.eup %2543  ;;  %2551 = vrcp.f32 %v1239_v9 }
 0x424   :  { %v1318_v2 = vsel %vm45_vm1, %v3156_v36, 0.0  ;;  %2553 = vrcp.f32 %v1236_v52 }
 0x425   :  { %1319 = vadd.xlane.f32.xlu1 %v1318_v2  ;;  %2555 = vrcp.f32 %v1233_v39  ;;  %v328_v2 = vadd.f32 %v2844_v51, %v2933_v33  ;;  %v3181_v51 = vadd.f32 %v2847_v53, %v2937_v35  ;;  %v1143_v35 = vsub.f32 %v2917_v25, %v3087_v7  ;;  %v3196_v50 = vpop.xlane.xlu1 %1277 }
 0x426   :  { %2557 = vrcp.f32 %v1230_v0 }
 0x427   :  { %v3160_v27 = vpop.eup %2545  ;;  %2559 = vrcp.f32 %v3110_v62 }
 0x428   :  { %v1315_v18 = vsel %vm45_vm1, %v3160_v27, 0.0  ;;  %v2548_v57 = vpop.eup %2547 }
 0x429   :  { %1316 = vadd.xlane.f32.xlu0 %v1315_v18  ;;  %v1332_v34 = vmul.f32 %v2548_v57, %v3007_v5 }
 0x42f   :  { %v2550_v41 = vpop.eup %2549 }
 0x430   :  { %v1334_v43 = vmul.f32 %v2550_v41, %v3047_v4  ;;  %v2552_v60 = vpop.eup %2551 }
 0x431   :  { %v1330_v52 = vmul.f32 %v2552_v60, %v3011_v14  ;;  %v2554_v4 = vpop.eup %2553  ;;  %v1144_v14 = vsub.f32 %v2913_v23, %v3078_v48  ;;  %v1189_v23 = vmul.f32 1.442695, %v1143_v35 }
 0x432   :  { %2380 = vmatprep.subr.msk.mxu1 %vm45_vm1, %v1334_v43  ;;  %v1328_v5 = vmul.f32 %v2554_v4, %v3043_v28  ;;  %v2556_v39 = vpop.eup %2555 }
 0x433   :  { %2381 = vmatpush3.xpose.msk.msra.mxu1 %vm45_vm1, %v1334_v43  ;;  %v1326_v33 = vmul.f32 %v2556_v39, %v3003_v6  ;;  %v2558_v62 = vpop.eup %2557  ;;  %v1191_v53 = vmul.f32 1.442695, %v1144_v14 }
 0x434   :  { %2382 = vmatprep.subr.msk.mxu1 %vm45_vm1, %v1332_v34  ;;  %v1324_v28 = vmul.f32 %v2558_v62, %v3039_v63  ;;  %v2560_v9 = vpop.eup %2559  ;;  %v3201_v63 = vpop.xlane.xlu1 %1274 }
 0x435   :  { %v1322_v6 = vmul.f32 %v2560_v9, %v2961_v58  ;;  %2561 = vpow2.f32 %v1191_v53 }
 0x436   :  { %1510 = vrot.lane.b32.xlu1 %v328_v2, %s2625_s22  ;;  %2563 = vpow2.f32 %v1189_v23 }
 0x437   :  { %2383 = vmatpush3.xpose.msk.msra.mxu1 %vm45_vm1, %v1332_v34  ;;  %v3236_v34 = vadd.f32 %v2851_v55, %v2943_v38  ;;  %v1137_v55 = vsub.f32 %v2893_v13, %v3061_v29 }
 0x438   :  { %2384 = vmatprep.subr.msk.mxu1 %vm45_vm1, %v1330_v52 }
 0x439   :  { %v1177_v39 = vmul.f32 1.442695, %v1137_v55 }
 0x43b   :  { %2385 = vmatpush3.xpose.msk.msra.mxu1 %vm45_vm1, %v1330_v52 }
 0x43c   :  { %2386 = vmatprep.subr.msk.mxu1 %vm45_vm1, %v1328_v5 }
 0x43f   :  { %1774 = vrot.lane.b32.xlu0 %v3181_v51, %s2625_s22  ;;  %2387 = vmatpush3.xpose.msk.msra.mxu1 %vm45_vm1, %v1328_v5  ;;  %v1141_v5 = vsub.f32 %v2909_v21, %v3072_v59 }
 0x440   :  { %2388 = vmatprep.subr.msk.mxu1 %vm45_vm1, %v1326_v33 }
 0x442   :  { %v3214_v48 = vpop.eup %2561 }
 0x443   :  { %2389 = vmatpush3.xpose.msk.msra.mxu1 %vm45_vm1, %v1326_v33  ;;  %v1270_v31 = vsel %vm45_vm1, %v3214_v48, 0.0  ;;  %v3218_v0 = vpop.eup %2563 }
 0x444   :  { %2390 = vmatprep.subr.msk.mxu1 %vm45_vm1, %v1324_v28 }
 0x447   :  { %2391 = vmatpush3.xpose.msk.msra.mxu1 %vm45_vm1, %v1324_v28 }
 0x448   :  { %2392 = vmatprep.subr.msk.mxu1 %vm45_vm1, %v1322_v6 }
 0x44b   :  { %2393 = vmatpush3.xpose.msk.msra.mxu1 %vm45_vm1, %v1322_v6 }
 0x44e   :  { %2395 = vmatmul.mubr.msk.f32.vlgmr.msra.gmra.mxu1 %vm45_vm1, %v3019_v20  ;;  %v1267_v20 = vsel %vm45_vm1, %v3218_v0, 0.0 }
 0x44f   :  { %2397 = vmatprep.mubr.msk.f32.mxu1 %vm45_vm1, %v328_v2  ;;  %v1140_v2 = vsub.f32 %v2897_v15, %v3063_v32  ;;  %v1138_v15 = vsub.f32 %v2889_v11, %v3059_v26 }
 0x451   :  { %v3206_v25 = vpop.xlane.xlu1 %1301  ;;  %v1183_v38 = vmul.f32 1.442695, %v1140_v2  ;;  %v1179_v59 = vmul.f32 1.442695, %v1138_v15 }
 0x452   :  { %2398 = vmatmul.mubr.msk.f32.gmra.mxu1 %vm45_vm1, %v3142_v44 }
 0x453   :  { %2438 = vmatprep.mubr.msk.f32.mxu1 %vm45_vm1, %v3148_v30  ;;  %v3226_v30 = vadd.f32 %v2853_v56, %v2947_v40  ;;  %v1142_v56 = vsub.f32 %v2905_v19, %v3069_v61  ;;  %v1139_v19 = vsub.f32 %v2901_v17, %v3065_v45  ;;  %v1185_v61 = vmul.f32 1.442695, %v1141_v5 }
 0x455   :  { %v3212_v58 = vpop.xlane.xlu1 %1298  ;;  %v1187_v52 = vmul.f32 1.442695, %v1142_v56  ;;  %v1181_v32 = vmul.f32 1.442695, %v1139_v19 }
 0x459   :  { %v1284_v7 = vpop.xlane.xlu1 %1283 }
 0x45a   :  { %1271 = vadd.xlane.f32.xlu1 %v1270_v31 }
 0x45d   :  { %v1281_v54 = vpop.xlane.xlu1 %1280 }
 0x45e   :  { %1268 = vadd.xlane.f32.xlu0 %v1267_v20 }
 0x461   :  { %v3222_v44 = vpop.xlane.xlu1 %1307 }
 0x465   :  { %v3230_v41 = vpop.xlane.xlu0 %1304 }
 0x469   :  { %v1290_v18 = vpop.xlane.xlu1 %1289 }
 0x46b   :  { %1776 = vrot.lane.b32.xlu1 %v3226_v30, %s2625_s22 }
 0x46d   :  { %v1287_v57 = vpop.xlane.xlu1 %1286 }
 0x471   :  { %v3232_v43 = vpop.xlane.xlu1 %1313 }
 0x474   :  { %1778 = vrot.lane.b32.xlu0 %v3236_v34, %s2625_s22 }
 0x475   :  { %v3242_v40 = vpop.xlane.xlu0 %1310  ;;  %v1293_v60 = vpop.xlane.xlu1 %1292 }
 0x476   :  { %2565 = vrcp.f32 %v1293_v60 }
 0x479   :  { %v1296_v4 = vpop.xlane.xlu0 %1295 }
 0x47a   :  { %2567 = vrcp.f32 %v1296_v4 }
 0x47b   :  { %2569 = vpow2.f32 %v1187_v52 }
 0x47c   :  { %2571 = vrcp.f32 %v1290_v18 }
 0x47d   :  { %2573 = vpow2.f32 %v1183_v38 }
 0x47e   :  { %2575 = vpow2.f32 %v1185_v61 }
 0x47f   :  { %2577 = vrcp.f32 %v1287_v57  ;;  %v1513_v57 = vpop.permute.xlu0 %1512 }
 0x480   :  { %2579 = vpow2.f32 %v1177_v39 }
 0x481   :  { %2581 = vpow2.f32 %v1181_v32 }
 0x482   :  { %2583 = vrcp.f32 %v1284_v7 }
 0x483   :  { %v2566_v21 = vpop.eup %2565  ;;  %2585 = vpow2.f32 %v1179_v59 }
 0x484   :  { %v1366_v17 = vmul.f32 %v2566_v21, %v3125_v42  ;;  %2587 = vrcp.f32 %v1281_v54 }
 0x485   :  { %2589 = vrcp.f32 %v3196_v50 }
 0x486   :  { %2591 = vrcp.f32 %v3201_v63 }
 0x487   :  { %v2568_v13 = vpop.eup %2567 }
 0x488   :  { %v1368_v29 = vmul.f32 %v2568_v13, %v3133_v16  ;;  %v3255_v33 = vpop.eup %2569 }
 0x489   :  { %v2572_v45 = vpop.eup %2571  ;;  %v1264_v26 = vsel %vm45_vm1, %v3255_v33, 0.0 }
 0x48a   :  { %2400 = vmatprep.subr.msk.mxu0 %vm45_vm1, %v1368_v29  ;;  %v3261_v11 = vpop.eup %2573  ;;  %v1364_v16 = vmul.f32 %v2572_v45, %v3113_v46 }
 0x48b   :  { %2401 = vmatpush3.xpose.msk.msra.mxu0 %vm45_vm1, %v1368_v29  ;;  %v3266_v62 = vpop.eup %2575  ;;  %v1258_v9 = vsel %vm45_vm1, %v3261_v11, 0.0 }
 0x48c   :  { %2402 = vmatprep.subr.msk.mxu0 %vm45_vm1, %v1366_v17  ;;  %v2578_v42 = vpop.eup %2577  ;;  %v1261_v28 = vsel %vm45_vm1, %v3266_v62, 0.0 }
 0x48d   :  { %v3271_v14 = vpop.eup %2579  ;;  %v1362_v46 = vmul.f32 %v2578_v42, %v3117_v49 }
 0x48e   :  { %v3277_v53 = vpop.eup %2581  ;;  %v1249_v6 = vsel %vm45_vm1, %v3271_v14, 0.0 }
 0x48f   :  { %1265 = vadd.xlane.f32.xlu1 %v1264_v26  ;;  %2403 = vmatpush3.xpose.msk.msra.mxu0 %vm45_vm1, %v1366_v17  ;;  %v2584_v35 = vpop.eup %2583  ;;  %v1255_v50 = vsel %vm45_vm1, %v3277_v53, 0.0 }
 0x490   :  { %2404 = vmatprep.subr.msk.mxu0 %vm45_vm1, %v1364_v16  ;;  %v3287_v23 = vpop.eup %2585  ;;  %v1360_v63 = vmul.f32 %v2584_v35, %v3090_v1 }
 0x491   :  { %v2588_v7 = vpop.eup %2587  ;;  %v1252_v49 = vsel %vm45_vm1, %v3287_v23, 0.0 }
 0x492   :  { %v1358_v31 = vmul.f32 %v2588_v7, %v3095_v24  ;;  %v2590_v20 = vpop.eup %2589  ;;  %v1773_v24 = vpop.permute.xlu0 %1772 }
 0x493   :  { %1262 = vadd.xlane.f32.xlu0 %v1261_v28  ;;  %1259 = vadd.xlane.f32.xlu1 %v1258_v9  ;;  %v1356_v54 = vmul.f32 %v2590_v20, %v3051_v8  ;;  %v2592_v18 = vpop.eup %2591 }
 0x494   :  { %2405 = vmatpush3.xpose.msk.msra.mxu0 %vm45_vm1, %v1364_v16  ;;  %v1354_v1 = vmul.f32 %v2592_v18, %v3055_v22  ;;  %v1932_v18 = vld [vmem:[%s3432_s4 + $0x18] sm:$0xff] }
 0x495   :  { %2406 = vmatprep.subr.msk.mxu0 %vm45_vm1, %v1362_v46 }
 0x497   :  { %1250 = vadd.xlane.f32.xlu0 %v1249_v6  ;;  %1256 = vadd.xlane.f32.xlu1 %v1255_v50 }
 0x498   :  { %2407 = vmatpush3.xpose.msk.msra.mxu0 %vm45_vm1, %v1362_v46 }
 0x499   :  { %2408 = vmatprep.subr.msk.mxu0 %vm45_vm1, %v1360_v63 }
 0x49b   :  { %1253 = vadd.xlane.f32.xlu1 %v1252_v49 }
 0x49c   :  { %2409 = vmatpush3.xpose.msk.msra.mxu0 %vm45_vm1, %v1360_v63 }
 0x49d   :  { %2410 = vmatprep.subr.msk.mxu0 %vm45_vm1, %v1358_v31 }
 0x4a0   :  { %2411 = vmatpush3.xpose.msk.msra.mxu0 %vm45_vm1, %v1358_v31 }
 0x4a1   :  { %2412 = vmatprep.subr.msk.mxu0 %vm45_vm1, %v1356_v54 }
 0x4a4   :  { %2413 = vmatpush3.xpose.msk.msra.mxu0 %vm45_vm1, %v1356_v54  ;;  %v1930_v54 = vld [vmem:[%s3432_s4 + $0x8] sm:$0xff] }
 0x4a5   :  { %2414 = vmatprep.subr.msk.mxu0 %vm45_vm1, %v1354_v1 }
 0x4a8   :  { %2415 = vmatpush3.xpose.msk.msra.mxu0 %vm45_vm1, %v1354_v1 }
 0x4ab   :  { %2417 = vmatmul.mubr.msk.f32.vlgmr.msra.gmra.mxu0 %vm45_vm1, %v3152_v10 }
 0x4ae   :  { %v1320_v56 = vpop.xlane.xlu1 %1319 }
 0x4af   :  { %2593 = vrcp.f32 %v1320_v56 }
 0x4b0   :  { %2595 = vrcp.f32 %v3232_v43 }
 0x4b2   :  { %v1511_v8 = vpop.permute.xlu1 %1510  ;;  %v1317_v60 = vpop.xlane.xlu0 %1316 }
 0x4b3   :  { %2597 = vrcp.f32 %v1317_v60  ;;  %2419 = vmatprep.mubr.msk.f32.mxu0 %vm45_vm1, %v1511_v8 }
 0x4b4   :  { %2420 = vmatmul.mubr.msk.f32.gmra.mxu0 %vm45_vm1, %v1513_v57  ;;  %2599 = vrcp.f32 %v3242_v40 }
 0x4b5   :  { %2460 = vmatprep.mubr.msk.f32.mxu0 %vm45_vm1, %v1773_v24  ;;  %2601 = vrcp.f32 %v3222_v44 }
 0x4b6   :  { %2603 = vrcp.f32 %v3230_v41 }
 0x4b7   :  { %2605 = vrcp.f32 %v3206_v25 }
 0x4b8   :  { %2607 = vrcp.f32 %v3212_v58 }
 0x4bc   :  { %v2594_v22 = vpop.eup %2593 }
 0x4bd   :  { %v1384_v10 = vmul.f32 %v2594_v22, %v3156_v36  ;;  %v2596_v2 = vpop.eup %2595 }
 0x4be   :  { %v1380_v40 = vmul.f32 %v2596_v2, %v3121_v12 }
 0x4bf   :  { %2444 = vmatprep.subr.msk.mxu0 %vm45_vm1, %v1384_v10 }
 0x4c0   :  { %v2598_v43 = vpop.eup %2597  ;;  %2445 = vmatpush3.xpose.msk.msra.mxu0 %vm45_vm1, %v1384_v10 }
 0x4c1   :  { %v1382_v52 = vmul.f32 %v2598_v43, %v3160_v27  ;;  %v2600_v44 = vpop.eup %2599 }
 0x4c2   :  { %v1378_v36 = vmul.f32 %v2600_v44, %v3127_v47  ;;  %v2602_v41 = vpop.eup %2601  ;;  %v3438_v47 = vld [vmem:[#allocation2_spill] sm:$0xff] }
 0x4c3   :  { %2446 = vmatprep.subr.msk.mxu0 %vm45_vm1, %v1382_v52  ;;  %v1376_v27 = vmul.f32 %v2602_v41, %v3101_v37  ;;  %v2604_v25 = vpop.eup %2603  ;;  %v3439_v37 = vld [vmem:[#allocation3_spill] sm:$0xff] }
 0x4c4   :  { %2447 = vmatpush3.xpose.msk.msra.mxu0 %vm45_vm1, %v1382_v52  ;;  %v1374_v12 = vmul.f32 %v2604_v25, %v3106_v3  ;;  %v2606_v4 = vpop.eup %2605  ;;  %v1775_v3 = vpop.permute.xlu0 %1774 }
 0x4c5   :  { %2448 = vmatprep.subr.msk.mxu0 %vm45_vm1, %v1380_v40  ;;  %v1372_v58 = vmul.f32 %v2606_v4, %v3438_v47  ;;  %v2608_v5 = vpop.eup %2607 }
 0x4c6   :  { %v1370_v55 = vmul.f32 %v2608_v5, %v3439_v37 }
 0x4c8   :  { %2449 = vmatpush3.xpose.msk.msra.mxu0 %vm45_vm1, %v1380_v40 }
 0x4c9   :  { %2450 = vmatprep.subr.msk.mxu0 %vm45_vm1, %v1378_v36 }
 0x4cc   :  { %2451 = vmatpush3.xpose.msk.msra.mxu0 %vm45_vm1, %v1378_v36 }
 0x4cd   :  { %2452 = vmatprep.subr.msk.mxu0 %vm45_vm1, %v1376_v27 }
 0x4d0   :  { %2453 = vmatpush3.xpose.msk.msra.mxu0 %vm45_vm1, %v1376_v27 }
 0x4d1   :  { %2454 = vmatprep.subr.msk.mxu0 %vm45_vm1, %v1374_v12 }
 0x4d4   :  { %2455 = vmatpush3.xpose.msk.msra.mxu0 %vm45_vm1, %v1374_v12 }
 0x4d5   :  { %2456 = vmatprep.subr.msk.mxu0 %vm45_vm1, %v1372_v58 }
 0x4d8   :  { %2457 = vmatpush3.xpose.msk.msra.mxu0 %vm45_vm1, %v1372_v58 }
 0x4d9   :  { %2458 = vmatprep.subr.msk.mxu0 %vm45_vm1, %v1370_v55 }
 0x4dc   :  { %2459 = vmatpush3.xpose.msk.msra.mxu0 %vm45_vm1, %v1370_v55 }
 0x4df   :  { %2461 = vmatmul.mubr.msk.f32.vlgmr.msra.gmra.mxu0 %vm45_vm1, %v1775_v3 }
 0x4e3   :  { %v1272_v38 = vpop.xlane.xlu1 %1271 }
 0x4e4   :  { %2609 = vrcp.f32 %v1272_v38 }
 0x4e7   :  { %v1777_v19 = vpop.permute.xlu1 %1776  ;;  %v1269_v61 = vpop.xlane.xlu0 %1268 }
 0x4e8   :  { %2611 = vrcp.f32 %v1269_v61  ;;  %2463 = vmatprep.mubr.msk.f32.mxu0 %vm45_vm1, %v1777_v19 }
 0x4eb   :  { %v1779_v39 = vpop.permute.xlu0 %1778 }
 0x4ec   :  { %2464 = vmatmul.mubr.msk.f32.gmra.mxu0 %vm45_vm1, %v1779_v39 }
 0x4f1   :  { %v2610_v15 = vpop.eup %2609 }
 0x4f2   :  { %v1352_v32 = vmul.f32 %v2610_v15, %v3214_v48 }
 0x4f4   :  { %2422 = vmatprep.subr.msk.mxu1 %vm45_vm1, %v1352_v32 }
 0x4f5   :  { %v2612_v21 = vpop.eup %2611  ;;  %2423 = vmatpush3.xpose.msk.msra.mxu1 %vm45_vm1, %v1352_v32 }
 0x4f6   :  { %v1350_v59 = vmul.f32 %v2612_v21, %v3218_v0 }
 0x4f8   :  { %2424 = vmatprep.subr.msk.mxu1 %vm45_vm1, %v1350_v59 }
 0x4f9   :  { %2425 = vmatpush3.xpose.msk.msra.mxu1 %vm45_vm1, %v1350_v59  ;;  %v1926_v59 = vld [vmem:[%s3431_s3 + $0x8] sm:$0xff] }
 0x50e   :  { %v2396_v1 = vpop.f32.mrf.mxu1 }
 0x510   :  { %v1487_v57 = vpop.f32.mrf.mxu1 }
 0x512   :  { %v2399_v24 = vpop.f32.mrf.mxu1 }
 0x514   :  { %v1497_v56 = vpop.f32.mrf.mxu1 }
 0x518   :  { %v1266_v13 = vpop.xlane.xlu1 %1265 }
 0x519   :  { %2613 = vrcp.f32 %v1266_v13  ;;  %v1927_v13 = vld [vmem:[%s3431_s3 + $0x10] sm:$0xff] }
 0x51c   :  { %v1260_v29 = vpop.xlane.xlu1 %1259  ;;  %v1263_v17 = vpop.xlane.xlu0 %1262 }
 0x51d   :  { %2615 = vrcp.f32 %v1260_v29  ;;  %v1928_v29 = vld [vmem:[%s3431_s3 + $0x18] sm:$0xff] }
 0x51e   :  { %2617 = vrcp.f32 %v1263_v17 }
 0x520   :  { %v1257_v45 = vpop.xlane.xlu1 %1256  ;;  %v1251_v16 = vpop.xlane.xlu0 %1250 }
 0x521   :  { %2619 = vrcp.f32 %v1257_v45 }
 0x524   :  { %v1254_v48 = vpop.xlane.xlu1 %1253 }
 0x525   :  { %2621 = vrcp.f32 %v1254_v48 }
 0x526   :  { %v2614_v26 = vpop.eup %2613  ;;  %2623 = vrcp.f32 %v1251_v16 }
 0x527   :  { %v1348_v42 = vmul.f32 %v2614_v26, %v3255_v33 }
 0x529   :  { %2426 = vmatprep.subr.msk.mxu1 %vm45_vm1, %v1348_v42 }
 0x52a   :  { %v2616_v0 = vpop.eup %2615  ;;  %2427 = vmatpush3.xpose.msk.msra.mxu1 %vm45_vm1, %v1348_v42 }
 0x52b   :  { %v2618_v28 = vpop.eup %2617  ;;  %v1344_v46 = vmul.f32 %v2616_v0, %v3261_v11 }
 0x52c   :  { %v1346_v9 = vmul.f32 %v2618_v28, %v3266_v62 }
 0x52e   :  { %2428 = vmatprep.subr.msk.mxu1 %vm45_vm1, %v1346_v9  ;;  %v2620_v35 = vpop.eup %2619 }
 0x52f   :  { %2429 = vmatpush3.xpose.msk.msra.mxu1 %vm45_vm1, %v1346_v9  ;;  %v1342_v33 = vmul.f32 %v2620_v35, %v3277_v53 }
 0x530   :  { %2430 = vmatprep.subr.msk.mxu1 %vm45_vm1, %v1344_v46 }
 0x532   :  { %v2622_v6 = vpop.eup %2621 }
 0x533   :  { %2431 = vmatpush3.xpose.msk.msra.mxu1 %vm45_vm1, %v1344_v46  ;;  %v1340_v50 = vmul.f32 %v2622_v6, %v3287_v23  ;;  %v2624_v63 = vpop.eup %2623 }
 0x534   :  { %2432 = vmatprep.subr.msk.mxu1 %vm45_vm1, %v1342_v33  ;;  %v1338_v11 = vmul.f32 %v2624_v63, %v3271_v14 }
 0x537   :  { %2433 = vmatpush3.xpose.msk.msra.mxu1 %vm45_vm1, %v1342_v33 }
 0x538   :  { %2434 = vmatprep.subr.msk.mxu1 %vm45_vm1, %v1340_v50 }
 0x53b   :  { %2435 = vmatpush3.xpose.msk.msra.mxu1 %vm45_vm1, %v1340_v50 }
 0x53c   :  { %2436 = vmatprep.subr.msk.mxu1 %vm45_vm1, %v1338_v11 }
 0x53f   :  { %2437 = vmatpush3.xpose.msk.msra.mxu1 %vm45_vm1, %v1338_v11 }
 0x542   :  { %2439 = vmatmul.mubr.msk.f32.vlgmr.msra.gmra.mxu1 %vm45_vm1, %v3181_v51  ;;  %v1925_v51 = vld [vmem:[%s3431_s3] sm:$0xff] }
 0x543   :  { %2441 = vmatprep.mubr.msk.f32.mxu1 %vm45_vm1, %v3226_v30  ;;  %v1929_v30 = vld [vmem:[%s3432_s4] sm:$0xff] }
 0x546   :  { %2442 = vmatmul.mubr.msk.f32.gmra.mxu1 %vm45_vm1, %v3236_v34  ;;  %v1931_v34 = vld [vmem:[%s3432_s4 + $0x10] sm:$0xff] }
 0x547   :  { %2482 = vmatprep.mubr.msk.f32.mxu1 %vm45_vm1, %v1925_v51 }
 0x56b   :  { %v2418_v62 = vpop.f32.mrf.mxu0 }
 0x56d   :  { %v1612_v53 = vpop.f32.mrf.mxu0 }
 0x574   :  { %v2421_v23 = vpop.f32.mrf.mxu0 }
 0x576   :  { %v1622_v7 = vpop.f32.mrf.mxu0 }
 0x59f   :  { %v2462_v14 = vpop.f32.mrf.mxu0 }
 0x5a1   :  { %v1878_v49 = vpop.f32.mrf.mxu0 }
 0x5ac   :  { %v2465_v31 = vpop.f32.mrf.mxu0 }
 0x5ad   :  { %1907 = vrot.lane.b32.xlu1 %v2465_v31, %s2625_s22 }
 0x5ae   :  { %v1888_v20 = vpop.f32.mrf.mxu0 }
 0x5af   :  { %1905 = vrot.lane.b32.xlu0 %v1888_v20, %s2625_s22 }
 0x5b1   :  { %1903 = vrot.lane.b32.xlu1 %v2462_v14, %s2625_s22 }
 0x5b3   :  { %1641 = vrot.lane.b32.xlu0 %v2421_v23, %s2625_s22 }
 0x5b5   :  { %1901 = vrot.lane.b32.xlu1 %v1878_v49, %s2625_s22 }
 0x5b7   :  { %1637 = vrot.lane.b32.xlu0 %v2418_v62, %s2625_s22 }
 0x5b9   :  { %1639 = vrot.lane.b32.xlu1 %v1622_v7, %s2625_s22 }
 0x5bb   :  { %1935 = vperm.xlu0 %2495, %v1929_v30  }
 0x5bd   :  { %1635 = vrot.lane.b32.xlu1 %v1612_v53, %s2625_s22 }
 0x5bf   :  { %1945 = vperm.xlu0 %2495, %v1931_v34  }
 0x5c1   :  { %1940 = vperm.xlu1 %2496, %v1930_v54  }
 0x5c5   :  { %1950 = vperm.xlu1 %2496, %v1932_v18  }
 0x602   :  { %v2440_v8 = vpop.f32.mrf.mxu1 }
 0x604   :  { %v1753_v60 = vpop.f32.mrf.mxu1 }
 0x606   :  { %v2443_v22 = vpop.f32.mrf.mxu1 }
 0x608   :  { %v1763_v43 = vpop.f32.mrf.mxu1 }
 0x61f   :  { %v1908_v10 = vpop.permute.xlu1 %1907 }
 0x620   :  { %v1916_v2 = vsel %vm45_vm1, %v2443_v22, %v1908_v10 }
 0x621   :  { %v1924_v52 = vmax.f32 %v1916_v2, 0.0  ;;  %v1906_v40 = vpop.permute.xlu0 %1905 }
 0x622   :  { %v1915_v44 = vsel %vm45_vm1, %v1763_v43, %v1906_v40 }
 0x623   :  { %v1923_v36 = vmax.f32 %v1915_v44, 0.0  ;;  %v1904_v41 = vpop.permute.xlu1 %1903  ;;  %2466 = vmatprep.subr.mxu1 %v1924_v52 }
 0x624   :  { %v1914_v27 = vsel %vm45_vm1, %v2440_v8, %v1904_v41  ;;  %2467 = vmatpush3.msra.mxu1 %v1924_v52 }
 0x625   :  { %v1922_v25 = vmax.f32 %v1914_v27, 0.0  ;;  %2468 = vmatprep.subr.mxu1 %v1923_v36  ;;  %v1642_v12 = vpop.permute.xlu0 %1641 }
 0x626   :  { %2469 = vmatpush3.msra.mxu1 %v1923_v36  ;;  %v1650_v47 = vsel %vm45_vm1, %v2399_v24, %v1642_v12 }
 0x627   :  { %v1902_v4 = vpop.permute.xlu1 %1901  ;;  %2470 = vmatprep.subr.mxu1 %v1922_v25  ;;  %v1920_v55 = vmax.f32 %v1650_v47, 0.0 }
 0x628   :  { %v1913_v58 = vsel %vm45_vm1, %v1753_v60, %v1902_v4  ;;  %2471 = vmatpush3.msra.mxu1 %v1922_v25 }
 0x629   :  { %v1921_v5 = vmax.f32 %v1913_v58, 0.0  ;;  %v1638_v37 = vpop.permute.xlu0 %1637 }
 0x62a   :  { %v1648_v38 = vsel %vm45_vm1, %v2396_v1, %v1638_v37 }
 0x62b   :  { %v1640_v3 = vpop.permute.xlu1 %1639  ;;  %2472 = vmatprep.subr.mxu1 %v1921_v5  ;;  %v1918_v39 = vmax.f32 %v1648_v38, 0.0 }
 0x62c   :  { %v1649_v19 = vsel %vm45_vm1, %v1497_v56, %v1640_v3  ;;  %2473 = vmatpush3.msra.mxu1 %v1921_v5 }
 0x62d   :  { %v1919_v61 = vmax.f32 %v1649_v19, 0.0  ;;  %2474 = vmatprep.subr.mxu1 %v1920_v55 }
 0x62e   :  { %2475 = vmatpush3.msra.mxu1 %v1920_v55 }
 0x62f   :  { %v1636_v15 = vpop.permute.xlu1 %1635  ;;  %2476 = vmatprep.subr.mxu1 %v1919_v61 }
 0x630   :  { %v1647_v32 = vsel %vm45_vm1, %v1487_v57, %v1636_v15  ;;  %2477 = vmatpush3.msra.mxu1 %v1919_v61 }
 0x631   :  { %v1917_v21 = vmax.f32 %v1647_v32, 0.0  ;;  %2478 = vmatprep.subr.mxu1 %v1918_v39 }
 0x632   :  { %2479 = vmatpush3.msra.mxu1 %v1918_v39 }
 0x633   :  { %2480 = vmatprep.subr.mxu1 %v1917_v21 }
 0x634   :  { %2481 = vmatpush3.msra.mxu1 %v1917_v21 }
 0x635   :  { %2483 = vmatmul.mubr.msk.f32.vlgmr.msra.gmra.mxu1 %vm45_vm1, %v1926_v59 }
 0x636   :  { %2485 = vmatprep.mubr.msk.f32.mxu1 %vm45_vm1, %v1927_v13  ;;  %v1936_v45 = vpop.permute.xlu0 %1935 }
 0x639   :  { %2486 = vmatmul.mubr.msk.f32.gmra.mxu1 %vm45_vm1, %v1928_v29 }
 0x63a   :  { %v1946_v46 = vpop.permute.xlu0 %1945 }
 0x63c   :  { %v1941_v17 = vpop.permute.xlu1 %1940 }
 0x640   :  { %v1951_v0 = vpop.permute.xlu1 %1950 }
 0x6f5   :  { %v2484_v48 = vpop.f32.mrf.mxu1 }
 0x6f6   :  { %v2037_v26 = vadd.f32 %v2484_v48, %v1941_v17 }
 0x6f7   :  { %v2031_v16 = vpop.f32.mrf.mxu1 }
 0x6f8   :  { %2051 = vst [vmem:[%s3433_s5 + $0x8] sm:$0xff] %v2037_v26  ;;  %v2032_v42 = vadd.f32 %v2031_v16, %v1936_v45 }
 0x6f9   :  { %v2487_v28 = vpop.f32.mrf.mxu1 }
 0x6fa   :  { %2050 = vst [vmem:[%s3433_s5] sm:$0xff] %v2032_v42  ;;  %v2047_v9 = vadd.f32 %v2487_v28, %v1951_v0 }
 0x6fb   :  { %v2041_v35 = vpop.f32.mrf.mxu1 }
 0x6fc   :  { %2053 = vst [vmem:[%s3433_s5 + $0x18] sm:$0xff] %v2047_v9  ;;  %v2042_v33 = vadd.f32 %v2041_v35, %v1946_v46 }
 0x6fe   :  { %2052 = vst [vmem:[%s3433_s5 + $0x10] sm:$0xff] %v2042_v33 }

</bundles_post_ra>
